<compile_context>
chip_gen: v7x
topology: tpu7x:2x2x1
jax: 0.10.0
libtpu: 0.0.40
codegen_flags: <defaults>
</compile_context>

<pallas_src>
import functools
import math

import jax
import jax.numpy as jnp
from jax.experimental import pallas as pl
from jax.experimental.pallas import tpu as pltpu

_VMEM_LIMIT = 48 * 1024 * 1024  # <= v7x physical (64 MiB), well under v5e/v6e


# ----------------------------------------------------------------------------
# helpers
# ----------------------------------------------------------------------------
def _round_up(x, m):
    return (x + m - 1) // m * m


def _row_tile(dim, cap):
    """Row (M) tile: full dim if it fits, else `cap` (multiple of 8/16)."""
    return dim if dim <= cap else cap


def _col_tile(dim, cap):
    """Column (N) tile: full dim if it fits, else `cap` (multiple of 128)."""
    return dim if dim <= cap else cap


# ----------------------------------------------------------------------------
# Fused (LayerNorm?) -> matmul -> (+bias, GELU?, layer-scale*out + residual?)
# Single full-K step: grid is (M_tiles, N_tiles), both parallel.
# ----------------------------------------------------------------------------
def _fused_matmul_kernel(*refs, has_ln, activation, has_residual, ln_eps):
    it = iter(refs)
    x_ref = next(it)
    if has_ln:
        g_ref = next(it)
        beta_ref = next(it)
    w_ref = next(it)
    bias_ref = next(it)
    if has_residual:
        res_ref = next(it)
        s_ref = next(it)
    o_ref = next(it)

    x = x_ref[...]
    if has_ln:
        xf = x.astype(jnp.float32)
        mu = jnp.mean(xf, axis=-1, keepdims=True)
        var = jnp.mean((xf - mu) ** 2, axis=-1, keepdims=True)
        xf = (xf - mu) * jax.lax.rsqrt(var + ln_eps)
        x = (xf * g_ref[...] + beta_ref[...]).astype(jnp.bfloat16)

    acc = jnp.dot(x, w_ref[...], preferred_element_type=jnp.float32)
    acc = acc + bias_ref[...].astype(jnp.float32)

    if activation == "gelu":
        # TODO(synk): tanh-approx GELU; PyTorch default is exact erf GELU.
        c = math.sqrt(2.0 / math.pi)
        acc = 0.5 * acc * (1.0 + jnp.tanh(c * (acc + 0.044715 * acc * acc * acc)))

    if has_residual:
        acc = res_ref[...].astype(jnp.float32) + s_ref[...] * acc

    o_ref[...] = acc.astype(o_ref.dtype)


def pallas_linear(x, w, b, *, ln_g=None, ln_b=None, residual=None, scale=None,
                  activation=None, out_dtype=jnp.bfloat16,
                  tm_cap=512, tn_cap=256, ln_eps=1e-6):
    """out = epilogue( LN?(x) @ w + b ).  x: (T, K), w: (K, N) bf16, b: (N,)."""
    T, K = x.shape
    N = w.shape[1]
    x = x.astype(jnp.bfloat16)
    w = w.astype(jnp.bfloat16)

    has_ln = ln_g is not None
    has_res = residual is not None

    tm = _row_tile(T, tm_cap)
    tn = _col_tile(N, tn_cap)
    grid = (pl.cdiv(T, tm), pl.cdiv(N, tn))

    in_specs = [pl.BlockSpec((tm, K), lambda i, j: (i, 0))]
    args = [x]
    if has_ln:
        in_specs += [pl.BlockSpec((1, K), lambda i, j: (0, 0)),
                     pl.BlockSpec((1, K), lambda i, j: (0, 0))]
        args += [ln_g.reshape(1, K).astype(jnp.float32),
                 ln_b.reshape(1, K).astype(jnp.float32)]
    in_specs += [pl.BlockSpec((K, tn), lambda i, j: (0, j)),
                 pl.BlockSpec((1, tn), lambda i, j: (0, j))]
    args += [w, b.reshape(1, N).astype(jnp.float32)]
    if has_res:
        in_specs += [pl.BlockSpec((tm, tn), lambda i, j: (i, j)),
                     pl.BlockSpec((1, tn), lambda i, j: (0, j))]
        args += [residual.astype(jnp.bfloat16),
                 scale.reshape(1, N).astype(jnp.float32)]

    kernel = functools.partial(_fused_matmul_kernel, has_ln=has_ln,
                               activation=activation, has_residual=has_res,
                               ln_eps=ln_eps)
    return pl.pallas_call(
        kernel,
        grid=grid,
        in_specs=in_specs,
        out_specs=pl.BlockSpec((tm, tn), lambda i, j: (i, j)),
        out_shape=jax.ShapeDtypeStruct((T, N), out_dtype),
        compiler_params=pltpu.CompilerParams(
            dimension_semantics=("parallel", "parallel"),
            vmem_limit_bytes=_VMEM_LIMIT),
    )(*args)


# ----------------------------------------------------------------------------
# Attention: one batch element per grid step; softmax scale pre-folded into
# q-projection weights; per-head output written straight into o_ref (no concat).
# ----------------------------------------------------------------------------
def _attn_kernel(qkv_ref, o_ref, *, heads):
    x = qkv_ref[0]                                   # (S, 3D) bf16
    D = x.shape[-1] // 3
    Dh = D // heads
    for h in range(heads):                           # static head loop
        q = x[:, h * Dh:(h + 1) * Dh]                # scale already folded in
        k = x[:, D + h * Dh:D + (h + 1) * Dh]
        v = x[:, 2 * D + h * Dh:2 * D + (h + 1) * Dh]
        s = jax.lax.dot_general(q, k, (((1,), (1,)), ((), ())),
                                preferred_element_type=jnp.float32)
        s = s - jnp.max(s, axis=-1, keepdims=True)
        p = jnp.exp(s)
        p = p * pl.reciprocal(jnp.sum(p, axis=-1, keepdims=True), approx=True)
        o_ref[0, :, h * Dh:(h + 1) * Dh] = jnp.dot(
            p.astype(x.dtype), v, preferred_element_type=jnp.float32
        ).astype(o_ref.dtype)


def pallas_attention(qkv, heads):
    """qkv: (N, S, 3D) bf16 (columns [q|k|v], head-major within each) -> (N, S, D) bf16."""
    N, S, D3 = qkv.shape
    D = D3 // 3
    return pl.pallas_call(
        functools.partial(_attn_kernel, heads=heads),
        grid=(N,),
        in_specs=[pl.BlockSpec((1, S, D3), lambda b: (b, 0, 0))],
        out_specs=pl.BlockSpec((1, S, D), lambda b: (b, 0, 0)),
        out_shape=jax.ShapeDtypeStruct((N, S, D), qkv.dtype),
        compiler_params=pltpu.CompilerParams(
            dimension_semantics=("parallel",),
            vmem_limit_bytes=_VMEM_LIMIT),
    )(qkv)


# ----------------------------------------------------------------------------
# Fused final LayerNorm (CLS token only) + max over views
# ----------------------------------------------------------------------------
def _cls_ln_max_kernel(x_ref, g_ref, b_ref, o_ref, *, eps):
    x = x_ref[0].astype(jnp.float32)                 # (V, D) CLS tokens
    mu = jnp.mean(x, axis=-1, keepdims=True)
    var = jnp.mean((x - mu) ** 2, axis=-1, keepdims=True)
    y = (x - mu) * jax.lax.rsqrt(var + eps) * g_ref[...] + b_ref[...]
    o_ref[0] = jnp.max(y, axis=0, keepdims=True).astype(o_ref.dtype)


def pallas_cls_ln_max(cls_bvd, g, b, *, eps=1e-6):
    """cls_bvd: (B, V, D) pre-final-LN CLS tokens -> (B, 1, D)."""
    B, V, D = cls_bvd.shape
    return pl.pallas_call(
        functools.partial(_cls_ln_max_kernel, eps=eps),
        grid=(B,),
        in_specs=[pl.BlockSpec((1, V, D), lambda i: (i, 0, 0)),
                  pl.BlockSpec((1, D), lambda i: (0, 0)),
                  pl.BlockSpec((1, D), lambda i: (0, 0))],
        out_specs=pl.BlockSpec((1, 1, D), lambda i: (i, 0, 0)),
        out_shape=jax.ShapeDtypeStruct((B, 1, D), jnp.float32),
        compiler_params=pltpu.CompilerParams(
            dimension_semantics=("parallel",),
            vmem_limit_bytes=_VMEM_LIMIT),
    )(cls_bvd, g.reshape(1, D), b.reshape(1, D))


# ----------------------------------------------------------------------------
# Parameter init (deterministic, synthetic — no checkpoint load) + prep
# ----------------------------------------------------------------------------
def init_params(key, *, C, patch, hidden, depth, heads, mlp_dim, num_patches):
    k = iter(jax.random.split(key, 8 + depth * 16))

    def nrm(shape, scale=0.02):
        return (scale * jax.random.normal(next(k), shape)).astype(jnp.float32)

    params = {
        "patch_w": nrm((hidden, C, patch, patch)),
        "patch_b": jnp.zeros((hidden,), jnp.float32),
        "cls_token": nrm((1, 1, hidden)),
        "pos_embed": nrm((1, 1 + num_patches, hidden)),
        "ln_f_g": jnp.ones((hidden,), jnp.float32),
        "ln_f_b": jnp.zeros((hidden,), jnp.float32),
        "layers": [],
    }
    for _ in range(depth):
        params["layers"].append({
            "ln1_g": jnp.ones((hidden,), jnp.float32),
            "ln1_b": jnp.zeros((hidden,), jnp.float32),
            "q_w": nrm((hidden, hidden)), "q_b": jnp.zeros((hidden,), jnp.float32),
            "k_w": nrm((hidden, hidden)), "k_b": jnp.zeros((hidden,), jnp.float32),
            "v_w": nrm((hidden, hidden)), "v_b": jnp.zeros((hidden,), jnp.float32),
            "o_w": nrm((hidden, hidden)), "o_b": jnp.zeros((hidden,), jnp.float32),
            "ls1": jnp.full((hidden,), 1e-5, jnp.float32),   # DINOv2 layer-scale
            "ln2_g": jnp.ones((hidden,), jnp.float32),
            "ln2_b": jnp.zeros((hidden,), jnp.float32),
            "fc1_w": nrm((hidden, mlp_dim)), "fc1_b": jnp.zeros((mlp_dim,), jnp.float32),
            "fc2_w": nrm((mlp_dim, hidden)), "fc2_b": jnp.zeros((hidden,), jnp.float32),
            "ls2": jnp.full((hidden,), 1e-5, jnp.float32),
        })
    return params


def prepare_params(raw, *, heads):
    """One-time weight prep: QKV fusion (softmax scale folded into q), padded
    128-aligned patch weights, bf16 casts."""
    D = raw["cls_token"].shape[-1]
    dh = D // heads
    attn_scale = 1.0 / math.sqrt(dh)

    pw = raw["patch_w"].reshape(D, -1).T                 # (C*p*p, D)
    kp = pw.shape[0]
    kp_pad = _round_up(kp, 128)
    pw_pad = jnp.zeros((kp_pad, D), pw.dtype).at[:kp].set(pw)

    p = {
        "patch_w_t": pw_pad.astype(jnp.bfloat16),        # (kp_pad, D)
        "patch_b": raw["patch_b"],
        "cls_token": raw["cls_token"],
        "pos_embed": raw["pos_embed"],
        "ln_f_g": raw["ln_f_g"], "ln_f_b": raw["ln_f_b"],
        "layers": [],
    }
    for L in raw["layers"]:
        p["layers"].append({
            "ln1_g": L["ln1_g"], "ln1_b": L["ln1_b"],
            "qkv_w": jnp.concatenate([L["q_w"] * attn_scale, L["k_w"], L["v_w"]],
                                     axis=1).astype(jnp.bfloat16),
            "qkv_b": jnp.concatenate([L["q_b"] * attn_scale, L["k_b"], L["v_b"]]),
            "o_w": L["o_w"].astype(jnp.bfloat16), "o_b": L["o_b"], "ls1": L["ls1"],
            "ln2_g": L["ln2_g"], "ln2_b": L["ln2_b"],
            "fc1_w": L["fc1_w"].astype(jnp.bfloat16), "fc1_b": L["fc1_b"],
            "fc2_w": L["fc2_w"].astype(jnp.bfloat16), "fc2_b": L["fc2_b"],
            "ls2": L["ls2"],
        })
    return p


# ----------------------------------------------------------------------------
# DINOv2-style backbone forward (returns pre-final-LN hidden states)
# ----------------------------------------------------------------------------
def dinov2_forward(params, x_nchw, cfg):
    N, C, H, W = x_nchw.shape
    p, D, heads = cfg["patch"], cfg["hidden"], cfg["heads"]
    Hp, Wp = H // p, W // p

    # Patch-embedding conv (stride == kernel == patch) as a matmul.  Cast to
    # bf16 before the XLA unfold; zero-pad K to the 128-aligned weight rows.
    patches = (x_nchw.astype(jnp.bfloat16)
               .reshape(N, C, Hp, p, Wp, p)
               .transpose(0, 2, 4, 1, 3, 5)
               .reshape(N * Hp * Wp, C * p * p))
    kp = C * p * p
    kp_pad = _round_up(kp, 128)
    if kp_pad != kp:
        patches = jnp.pad(patches, ((0, 0), (0, kp_pad - kp)))
    tok = pallas_linear(patches, params["patch_w_t"], params["patch_b"],
                        out_dtype=jnp.float32).reshape(N, Hp * Wp, D)

    cls = jnp.broadcast_to(params["cls_token"], (N, 1, D))
    h = jnp.concatenate([cls, tok], axis=1) + params["pos_embed"]
    S = h.shape[1]
    h2 = h.reshape(N * S, D).astype(jnp.bfloat16)          # bf16 residual stream

    for layer in params["layers"]:
        # --- attention block: LN1 fused into the QKV matmul prologue ---
        qkv = pallas_linear(h2, layer["qkv_w"], layer["qkv_b"],
                            ln_g=layer["ln1_g"], ln_b=layer["ln1_b"],
                            out_dtype=jnp.bfloat16)        # (N*S, 3D)
        a = pallas_attention(qkv.reshape(N, S, 3 * D), heads)  # (N, S, D) bf16
        h2 = pallas_linear(a.reshape(N * S, D), layer["o_w"], layer["o_b"],
                           residual=h2, scale=layer["ls1"],
                           out_dtype=jnp.bfloat16)          # h + ls1*proj

        # --- MLP block: LN2 + GELU fused into fc1; ls2 + residual into fc2 ---
        y = pallas_linear(h2, layer["fc1_w"], layer["fc1_b"],
                          ln_g=layer["ln2_g"], ln_b=layer["ln2_b"],
                          activation="gelu", out_dtype=jnp.bfloat16)
        h2 = pallas_linear(y, layer["fc2_w"], layer["fc2_b"],
                           residual=h2, scale=layer["ls2"],
                           out_dtype=jnp.bfloat16)          # h + ls2*mlp

    return h2.reshape(N, S, D)


# ----------------------------------------------------------------------------
# MV_DINOv2 forward: output is max over views of the (final-LN'd) CLS token.
# ----------------------------------------------------------------------------
def mv_dinov2_forward(params, x, num_views, cfg):
    N, C, H, W = x.shape
    B = N // num_views
    # x.view(B, V, C, H, W).permute(0, 2, 1, 3, 4).contiguous().view(-1, C, H, W)
    x5 = jnp.transpose(x.reshape(B, num_views, C, H, W), (0, 2, 1, 3, 4))
    x_scr = x5.reshape(N, C, H, W)

    h = dinov2_forward(params, x_scr, cfg)             # (B*V, S, D), pre-final-LN
    D = h.shape[-1]
    cls = h[:, 0, :].reshape(B, num_views, D)          # CLS token per view
    # Final LN is per-token, so LN(all)->slice CLS == slice CLS->LN. Fused here.
    return pallas_cls_ln_max(cls, params["ln_f_g"], params["ln_f_b"])  # (B,1,D)


# ----------------------------------------------------------------------------
if __name__ == "__main__":
    # Small shapes consistent with the module: N = batch * num_views images,
    # each C x H x W, scaled-down DINOv2 config.
    num_views = 4
    B, C, H, W = 2, 3, 14, 14
    patch, hidden, heads, depth = 7, 32, 2, 2
    mlp_dim = 4 * hidden
    num_patches = (H // patch) * (W // patch)

    cfg = dict(patch=patch, hidden=hidden, heads=heads)

    key = jax.random.PRNGKey(0)
    kx, kp = jax.random.split(key)
    x = jax.random.normal(kx, (B * num_views, C, H, W), dtype=jnp.float32)
    raw = init_params(kp, C=C, patch=patch, hidden=hidden, depth=depth,
                      heads=heads, mlp_dim=mlp_dim, num_patches=num_patches)
    params = prepare_params(raw, heads=heads)

    fwd = jax.jit(lambda p_, x_: mv_dinov2_forward(p_, x_, num_views, cfg))
    out = jax.block_until_ready(fwd(params, x))
    assert out.shape == (B, 1, hidden), out.shape
    print("KERNEL_OK")
</pallas_src>

<mosaic_0001>
module attributes {stable_mosaic.version = 11 : i64} {
  func.func @_fused_matmul_kernel(%arg0: i32, %arg1: i32, %arg2: memref<32x256xbf16, #tpu.memory_space<vmem>>, %arg3: memref<256x32xbf16, #tpu.memory_space<vmem>>, %arg4: memref<1x32xf32, #tpu.memory_space<vmem>>, %arg5: memref<32x32xf32, #tpu.memory_space<vmem>>) attributes {dimension_semantics = [#tpu.dimension_semantics<parallel>, #tpu.dimension_semantics<parallel>], iteration_bounds = array<i64: 1, 1>, scalar_prefetch = 0 : i64, scratch_operands = 0 : i64, tpu.core_type = #tpu.core_type<tc>, window_params = [{transform_indices = @transform_0, window_bounds = array<i64: 32, 256>}, {transform_indices = @transform_1, window_bounds = array<i64: 256, 32>}, {transform_indices = @transform_2, window_bounds = array<i64: 1, 32>}, {transform_indices = @transform_3, window_bounds = array<i64: 32, 32>}]} {
    %c0 = arith.constant 0 : index
    %c0_0 = arith.constant 0 : index
    %0 = vector.load %arg2[%c0, %c0_0] : memref<32x256xbf16, #tpu.memory_space<vmem>>, vector<32x256xbf16>
    %c0_1 = arith.constant 0 : index
    %c0_2 = arith.constant 0 : index
    %1 = vector.load %arg3[%c0_1, %c0_2] : memref<256x32xbf16, #tpu.memory_space<vmem>>, vector<256x32xbf16>
    %cst = arith.constant dense<0.000000e+00> : vector<32x32xf32>
    %2 = tpu.matmul %0, %1, %cst {dimension_numbers = #tpu.dot_dimension_numbers<[1], [0], [0], [1], [0, 0, 1, 1], [], []>} : vector<32x256xbf16>, vector<256x32xbf16>, vector<32x32xf32> -> vector<32x32xf32>
    %c0_3 = arith.constant 0 : index
    %c0_4 = arith.constant 0 : index
    %3 = vector.load %arg4[%c0_3, %c0_4] : memref<1x32xf32, #tpu.memory_space<vmem>>, vector<1x32xf32>
    %4 = vector.broadcast %3 : vector<1x32xf32> to vector<32x32xf32>
    %5 = arith.addf %2, %4 : vector<32x32xf32>
    %c0_5 = arith.constant 0 : index
    %c0_6 = arith.constant 0 : index
    %6 = vector.load %arg5[%c0_5, %c0_6] : memref<32x32xf32, #tpu.memory_space<vmem>>, vector<32x32xf32>
    tpu.vector_store %arg5[%c0_5, %c0_6], %5 {strides = array<i32>} : memref<32x32xf32, #tpu.memory_space<vmem>>, vector<32x32xf32>,
    return
  }
  func.func @transform_0(%arg0: i32, %arg1: i32) -> (i32, i32) {
    %c0_i32 = arith.constant 0 : i32
    %c0_i32_0 = arith.constant 0 : i32
    return %arg0, %c0_i32 : i32, i32
  }
  func.func @transform_1(%arg0: i32, %arg1: i32) -> (i32, i32) {
    %c0_i32 = arith.constant 0 : i32
    %c0_i32_0 = arith.constant 0 : i32
    return %c0_i32, %arg1 : i32, i32
  }
  func.func @transform_2(%arg0: i32, %arg1: i32) -> (i32, i32) {
    %c0_i32 = arith.constant 0 : i32
    %c0_i32_0 = arith.constant 0 : i32
    return %c0_i32, %arg1 : i32, i32
  }
  func.func @transform_3(%arg0: i32, %arg1: i32) -> (i32, i32) {
    %c0_i32 = arith.constant 0 : i32
    return %arg0, %arg1 : i32, i32
  }
}

module attributes {stable_mosaic.version = 11 : i64} {
  func.func @_fused_matmul_kernel(%arg0: i32, %arg1: i32, %arg2: memref<40x32xbf16, #tpu.memory_space<vmem>>, %arg3: memref<1x32xf32, #tpu.memory_space<vmem>>, %arg4: memref<1x32xf32, #tpu.memory_space<vmem>>, %arg5: memref<32x96xbf16, #tpu.memory_space<vmem>>, %arg6: memref<1x96xf32, #tpu.memory_space<vmem>>, %arg7: memref<40x96xbf16, #tpu.memory_space<vmem>>) attributes {dimension_semantics = [#tpu.dimension_semantics<parallel>, #tpu.dimension_semantics<parallel>], iteration_bounds = array<i64: 1, 1>, scalar_prefetch = 0 : i64, scratch_operands = 0 : i64, tpu.core_type = #tpu.core_type<tc>, window_params = [{transform_indices = @transform_0, window_bounds = array<i64: 40, 32>}, {pipeline_mode = #tpu.pipeline_mode<synchronous>, transform_indices = @transform_1, window_bounds = array<i64: 1, 32>}, {pipeline_mode = #tpu.pipeline_mode<synchronous>, transform_indices = @transform_2, window_bounds = array<i64: 1, 32>}, {transform_indices = @transform_3, window_bounds = array<i64: 32, 96>}, {transform_indices = @transform_4, window_bounds = array<i64: 1, 96>}, {transform_indices = @transform_5, window_bounds = array<i64: 40, 96>}]} {
    %c0 = arith.constant 0 : index
    %c0_0 = arith.constant 0 : index
    %0 = vector.load %arg2[%c0, %c0_0] : memref<40x32xbf16, #tpu.memory_space<vmem>>, vector<40x32xbf16>
    %1 = arith.extf %0 : vector<40x32xbf16> to vector<40x32xf32>
    %cst = arith.constant dense<0.000000e+00> : vector<40xf32>
    %2 = vector.multi_reduction <add>, %1, %cst [1] : vector<40x32xf32> to vector<40xf32>
    %3 = vector.shape_cast %2 : vector<40xf32> to vector<40x1xf32>
    %cst_1 = arith.constant 3.200000e+01 : f32
    %4 = vector.broadcast %cst_1 : f32 to vector<40x1xf32>
    %5 = arith.divf %3, %4 : vector<40x1xf32>
    %6 = vector.broadcast %5 : vector<40x1xf32> to vector<40x32xf32>
    %7 = arith.subf %1, %6 : vector<40x32xf32>
    %8 = arith.mulf %7, %7 : vector<40x32xf32>
    %cst_2 = arith.constant dense<0.000000e+00> : vector<40xf32>
    %9 = vector.multi_reduction <add>, %8, %cst_2 [1] : vector<40x32xf32> to vector<40xf32>
    %10 = vector.shape_cast %9 : vector<40xf32> to vector<40x1xf32>
    %cst_3 = arith.constant 3.200000e+01 : f32
    %11 = vector.broadcast %cst_3 : f32 to vector<40x1xf32>
    %12 = arith.divf %10, %11 : vector<40x1xf32>
    %13 = vector.broadcast %5 : vector<40x1xf32> to vector<40x32xf32>
    %14 = arith.subf %1, %13 : vector<40x32xf32>
    %cst_4 = arith.constant 9.99999997E-7 : f32
    %15 = vector.broadcast %cst_4 : f32 to vector<40x1xf32>
    %16 = arith.addf %12, %15 : vector<40x1xf32>
    %17 = math.rsqrt %16 : vector<40x1xf32>
    %18 = vector.broadcast %17 : vector<40x1xf32> to vector<40x32xf32>
    %19 = arith.mulf %14, %18 : vector<40x32xf32>
    %c0_5 = arith.constant 0 : index
    %c0_6 = arith.constant 0 : index
    %20 = vector.load %arg3[%c0_5, %c0_6] : memref<1x32xf32, #tpu.memory_space<vmem>>, vector<1x32xf32>
    %21 = vector.broadcast %20 : vector<1x32xf32> to vector<40x32xf32>
    %22 = arith.mulf %19, %21 : vector<40x32xf32>
    %c0_7 = arith.constant 0 : index
    %c0_8 = arith.constant 0 : index
    %23 = vector.load %arg4[%c0_7, %c0_8] : memref<1x32xf32, #tpu.memory_space<vmem>>, vector<1x32xf32>
    %24 = vector.broadcast %23 : vector<1x32xf32> to vector<40x32xf32>
    %25 = arith.addf %22, %24 : vector<40x32xf32>
    %26 = arith.truncf %25 : vector<40x32xf32> to vector<40x32xbf16>
    %c0_9 = arith.constant 0 : index
    %c0_10 = arith.constant 0 : index
    %27 = vector.load %arg5[%c0_9, %c0_10] : memref<32x96xbf16, #tpu.memory_space<vmem>>, vector<32x96xbf16>
    %cst_11 = arith.constant dense<0.000000e+00> : vector<40x96xf32>
    %28 = tpu.matmul %26, %27, %cst_11 {dimension_numbers = #tpu.dot_dimension_numbers<[1], [0], [0], [1], [0, 0, 1, 1], [], []>} : vector<40x32xbf16>, vector<32x96xbf16>, vector<40x96xf32> -> vector<40x96xf32>
    %c0_12 = arith.constant 0 : index
    %c0_13 = arith.constant 0 : index
    %29 = vector.load %arg6[%c0_12, %c0_13] : memref<1x96xf32, #tpu.memory_space<vmem>>, vector<1x96xf32>
    %30 = vector.broadcast %29 : vector<1x96xf32> to vector<40x96xf32>
    %31 = arith.addf %28, %30 : vector<40x96xf32>
    %32 = arith.truncf %31 : vector<40x96xf32> to vector<40x96xbf16>
    %c0_14 = arith.constant 0 : index
    %c0_15 = arith.constant 0 : index
    %33 = vector.load %arg7[%c0_14, %c0_15] : memref<40x96xbf16, #tpu.memory_space<vmem>>, vector<40x96xbf16>
    tpu.vector_store %arg7[%c0_14, %c0_15], %32 {strides = array<i32>} : memref<40x96xbf16, #tpu.memory_space<vmem>>, vector<40x96xbf16>,
    return
  }
  func.func @transform_0(%arg0: i32, %arg1: i32) -> (i32, i32) {
    %c0_i32 = arith.constant 0 : i32
    %c0_i32_0 = arith.constant 0 : i32
    return %arg0, %c0_i32 : i32, i32
  }
  func.func @transform_1(%arg0: i32, %arg1: i32) -> (i32, i32) {
    %c0_i32 = arith.constant 0 : i32
    %c0_i32_0 = arith.constant 0 : i32
    %c0_i32_1 = arith.constant 0 : i32
    return %c0_i32, %c0_i32_0 : i32, i32
  }
  func.func @transform_2(%arg0: i32, %arg1: i32) -> (i32, i32) {
    %c0_i32 = arith.constant 0 : i32
    %c0_i32_0 = arith.constant 0 : i32
    %c0_i32_1 = arith.constant 0 : i32
    return %c0_i32, %c0_i32_0 : i32, i32
  }
  func.func @transform_3(%arg0: i32, %arg1: i32) -> (i32, i32) {
    %c0_i32 = arith.constant 0 : i32
    %c0_i32_0 = arith.constant 0 : i32
    return %c0_i32, %arg1 : i32, i32
  }
  func.func @transform_4(%arg0: i32, %arg1: i32) -> (i32, i32) {
    %c0_i32 = arith.constant 0 : i32
    %c0_i32_0 = arith.constant 0 : i32
    return %c0_i32, %arg1 : i32, i32
  }
  func.func @transform_5(%arg0: i32, %arg1: i32) -> (i32, i32) {
    %c0_i32 = arith.constant 0 : i32
    return %arg0, %arg1 : i32, i32
  }
}

module attributes {stable_mosaic.version = 11 : i64} {
  func.func @_attn_kernel(%arg0: i32, %arg1: memref<1x5x96xbf16, #tpu.memory_space<vmem>>, %arg2: memref<1x5x32xbf16, #tpu.memory_space<vmem>>) attributes {dimension_semantics = [#tpu.dimension_semantics<parallel>], iteration_bounds = array<i64: 8>, scalar_prefetch = 0 : i64, scratch_operands = 0 : i64, tpu.core_type = #tpu.core_type<tc>, window_params = [{transform_indices = @transform_0, window_bounds = array<i64: 1, 5, 96>}, {transform_indices = @transform_1, window_bounds = array<i64: 1, 5, 32>}]} {
    %c0 = arith.constant 0 : index
    %c0_0 = arith.constant 0 : index
    %c0_1 = arith.constant 0 : index
    %0 = vector.load %arg1[%c0, %c0_0, %c0_1] : memref<1x5x96xbf16, #tpu.memory_space<vmem>>, vector<1x5x96xbf16>
    %1 = vector.shape_cast %0 : vector<1x5x96xbf16> to vector<5x96xbf16>
    %2 = vector.extract_strided_slice %1 {offsets = [0, 0], sizes = [5, 16], strides = [1, 1]} : vector<5x96xbf16> to vector<5x16xbf16>
    %3 = vector.extract_strided_slice %1 {offsets = [0, 32], sizes = [5, 16], strides = [1, 1]} : vector<5x96xbf16> to vector<5x16xbf16>
    %4 = vector.extract_strided_slice %1 {offsets = [0, 64], sizes = [5, 16], strides = [1, 1]} : vector<5x96xbf16> to vector<5x16xbf16>
    %cst = arith.constant dense<0.000000e+00> : vector<5x5xf32>
    %5 = tpu.matmul %2, %3, %cst {dimension_numbers = #tpu.dot_dimension_numbers<[1], [1], [0], [0], [0, 0, 1, 0], [], []>} : vector<5x16xbf16>, vector<5x16xbf16>, vector<5x5xf32> -> vector<5x5xf32>
    %cst_2 = arith.constant dense<0xFF800000> : vector<5xf32>
    %6 = vector.multi_reduction <maximumf>, %5, %cst_2 [1] : vector<5x5xf32> to vector<5xf32>
    %7 = vector.shape_cast %6 : vector<5xf32> to vector<5x1xf32>
    %8 = vector.broadcast %7 : vector<5x1xf32> to vector<5x5xf32>
    %9 = arith.subf %5, %8 : vector<5x5xf32>
    %10 = math.exp %9 : vector<5x5xf32>
    %cst_3 = arith.constant dense<0.000000e+00> : vector<5xf32>
    %11 = vector.multi_reduction <add>, %10, %cst_3 [1] : vector<5x5xf32> to vector<5xf32>
    %12 = vector.shape_cast %11 : vector<5xf32> to vector<5x1xf32>
    %13 = tpu.reciprocal %12 {approx = true} : vector<5x1xf32> -> vector<5x1xf32>
    %14 = vector.broadcast %13 : vector<5x1xf32> to vector<5x5xf32>
    %15 = arith.mulf %10, %14 : vector<5x5xf32>
    %16 = arith.truncf %15 : vector<5x5xf32> to vector<5x5xbf16>
    %cst_4 = arith.constant dense<0.000000e+00> : vector<5x16xf32>
    %17 = tpu.matmul %16, %4, %cst_4 {dimension_numbers = #tpu.dot_dimension_numbers<[1], [0], [0], [1], [0, 0, 1, 1], [], []>} : vector<5x5xbf16>, vector<5x16xbf16>, vector<5x16xf32> -> vector<5x16xf32>
    %18 = arith.truncf %17 : vector<5x16xf32> to vector<5x16xbf16>
    %c0_5 = arith.constant 0 : index
    %c0_6 = arith.constant 0 : index
    %c0_7 = arith.constant 0 : index
    %19 = vector.load %arg2[%c0_5, %c0_6, %c0_7] : memref<1x5x32xbf16, #tpu.memory_space<vmem>>, vector<1x5x16xbf16>
    %20 = vector.shape_cast %19 : vector<1x5x16xbf16> to vector<5x16xbf16>
    %21 = vector.shape_cast %18 : vector<5x16xbf16> to vector<1x5x16xbf16>
    tpu.vector_store %arg2[%c0_5, %c0_6, %c0_7], %21 {strides = array<i32>} : memref<1x5x32xbf16, #tpu.memory_space<vmem>>, vector<1x5x16xbf16>,
    %22 = vector.extract_strided_slice %1 {offsets = [0, 16], sizes = [5, 16], strides = [1, 1]} : vector<5x96xbf16> to vector<5x16xbf16>
    %23 = vector.extract_strided_slice %1 {offsets = [0, 48], sizes = [5, 16], strides = [1, 1]} : vector<5x96xbf16> to vector<5x16xbf16>
    %24 = vector.extract_strided_slice %1 {offsets = [0, 80], sizes = [5, 16], strides = [1, 1]} : vector<5x96xbf16> to vector<5x16xbf16>
    %cst_8 = arith.constant dense<0.000000e+00> : vector<5x5xf32>
    %25 = tpu.matmul %22, %23, %cst_8 {dimension_numbers = #tpu.dot_dimension_numbers<[1], [1], [0], [0], [0, 0, 1, 0], [], []>} : vector<5x16xbf16>, vector<5x16xbf16>, vector<5x5xf32> -> vector<5x5xf32>
    %cst_9 = arith.constant dense<0xFF800000> : vector<5xf32>
    %26 = vector.multi_reduction <maximumf>, %25, %cst_9 [1] : vector<5x5xf32> to vector<5xf32>
    %27 = vector.shape_cast %26 : vector<5xf32> to vector<5x1xf32>
    %28 = vector.broadcast %27 : vector<5x1xf32> to vector<5x5xf32>
    %29 = arith.subf %25, %28 : vector<5x5xf32>
    %30 = math.exp %29 : vector<5x5xf32>
    %cst_10 = arith.constant dense<0.000000e+00> : vector<5xf32>
    %31 = vector.multi_reduction <add>, %30, %cst_10 [1] : vector<5x5xf32> to vector<5xf32>
    %32 = vector.shape_cast %31 : vector<5xf32> to vector<5x1xf32>
    %33 = tpu.reciprocal %32 {approx = true} : vector<5x1xf32> -> vector<5x1xf32>
    %34 = vector.broadcast %33 : vector<5x1xf32> to vector<5x5xf32>
    %35 = arith.mulf %30, %34 : vector<5x5xf32>
    %36 = arith.truncf %35 : vector<5x5xf32> to vector<5x5xbf16>
    %cst_11 = arith.constant dense<0.000000e+00> : vector<5x16xf32>
    %37 = tpu.matmul %36, %24, %cst_11 {dimension_numbers = #tpu.dot_dimension_numbers<[1], [0], [0], [1], [0, 0, 1, 1], [], []>} : vector<5x5xbf16>, vector<5x16xbf16>, vector<5x16xf32> -> vector<5x16xf32>
    %38 = arith.truncf %37 : vector<5x16xf32> to vector<5x16xbf16>
    %c0_12 = arith.constant 0 : index
    %c0_13 = arith.constant 0 : index
    %c16 = arith.constant 16 : index
    %39 = vector.load %arg2[%c0_12, %c0_13, %c16] : memref<1x5x32xbf16, #tpu.memory_space<vmem>>, vector<1x5x16xbf16>
    %40 = vector.shape_cast %39 : vector<1x5x16xbf16> to vector<5x16xbf16>
    %41 = vector.shape_cast %38 : vector<5x16xbf16> to vector<1x5x16xbf16>
    tpu.vector_store %arg2[%c0_12, %c0_13, %c16], %41 {strides = array<i32>} : memref<1x5x32xbf16, #tpu.memory_space<vmem>>, vector<1x5x16xbf16>,
    return
  }
  func.func @transform_0(%arg0: i32) -> (i32, i32, i32) {
    %c0_i32 = arith.constant 0 : i32
    %c0_i32_0 = arith.constant 0 : i32
    %c0_i32_1 = arith.constant 0 : i32
    return %arg0, %c0_i32, %c0_i32_0 : i32, i32, i32
  }
  func.func @transform_1(%arg0: i32) -> (i32, i32, i32) {
    %c0_i32 = arith.constant 0 : i32
    %c0_i32_0 = arith.constant 0 : i32
    %c0_i32_1 = arith.constant 0 : i32
    return %arg0, %c0_i32, %c0_i32_0 : i32, i32, i32
  }
}

module attributes {stable_mosaic.version = 11 : i64} {
  func.func @_fused_matmul_kernel(%arg0: i32, %arg1: i32, %arg2: memref<40x32xbf16, #tpu.memory_space<vmem>>, %arg3: memref<32x32xbf16, #tpu.memory_space<vmem>>, %arg4: memref<1x32xf32, #tpu.memory_space<vmem>>, %arg5: memref<40x32xbf16, #tpu.memory_space<vmem>>, %arg6: memref<1x32xf32, #tpu.memory_space<vmem>>, %arg7: memref<40x32xbf16, #tpu.memory_space<vmem>>) attributes {dimension_semantics = [#tpu.dimension_semantics<parallel>, #tpu.dimension_semantics<parallel>], iteration_bounds = array<i64: 1, 1>, scalar_prefetch = 0 : i64, scratch_operands = 0 : i64, tpu.core_type = #tpu.core_type<tc>, window_params = [{transform_indices = @transform_0, window_bounds = array<i64: 40, 32>}, {transform_indices = @transform_1, window_bounds = array<i64: 32, 32>}, {transform_indices = @transform_2, window_bounds = array<i64: 1, 32>}, {transform_indices = @transform_3, window_bounds = array<i64: 40, 32>}, {transform_indices = @transform_4, window_bounds = array<i64: 1, 32>}, {transform_indices = @transform_5, window_bounds = array<i64: 40, 32>}]} {
    %c0 = arith.constant 0 : index
    %c0_0 = arith.constant 0 : index
    %0 = vector.load %arg2[%c0, %c0_0] : memref<40x32xbf16, #tpu.memory_space<vmem>>, vector<40x32xbf16>
    %c0_1 = arith.constant 0 : index
    %c0_2 = arith.constant 0 : index
    %1 = vector.load %arg3[%c0_1, %c0_2] : memref<32x32xbf16, #tpu.memory_space<vmem>>, vector<32x32xbf16>
    %cst = arith.constant dense<0.000000e+00> : vector<40x32xf32>
    %2 = tpu.matmul %0, %1, %cst {dimension_numbers = #tpu.dot_dimension_numbers<[1], [0], [0], [1], [0, 0, 1, 1], [], []>} : vector<40x32xbf16>, vector<32x32xbf16>, vector<40x32xf32> -> vector<40x32xf32>
    %c0_3 = arith.constant 0 : index
    %c0_4 = arith.constant 0 : index
    %3 = vector.load %arg4[%c0_3, %c0_4] : memref<1x32xf32, #tpu.memory_space<vmem>>, vector<1x32xf32>
    %4 = vector.broadcast %3 : vector<1x32xf32> to vector<40x32xf32>
    %5 = arith.addf %2, %4 : vector<40x32xf32>
    %c0_5 = arith.constant 0 : index
    %c0_6 = arith.constant 0 : index
    %6 = vector.load %arg5[%c0_5, %c0_6] : memref<40x32xbf16, #tpu.memory_space<vmem>>, vector<40x32xbf16>
    %7 = arith.extf %6 : vector<40x32xbf16> to vector<40x32xf32>
    %c0_7 = arith.constant 0 : index
    %c0_8 = arith.constant 0 : index
    %8 = vector.load %arg6[%c0_7, %c0_8] : memref<1x32xf32, #tpu.memory_space<vmem>>, vector<1x32xf32>
    %9 = vector.broadcast %8 : vector<1x32xf32> to vector<40x32xf32>
    %10 = arith.mulf %9, %5 : vector<40x32xf32>
    %11 = arith.addf %7, %10 : vector<40x32xf32>
    %12 = arith.truncf %11 : vector<40x32xf32> to vector<40x32xbf16>
    %c0_9 = arith.constant 0 : index
    %c0_10 = arith.constant 0 : index
    %13 = vector.load %arg7[%c0_9, %c0_10] : memref<40x32xbf16, #tpu.memory_space<vmem>>, vector<40x32xbf16>
    tpu.vector_store %arg7[%c0_9, %c0_10], %12 {strides = array<i32>} : memref<40x32xbf16, #tpu.memory_space<vmem>>, vector<40x32xbf16>,
    return
  }
  func.func @transform_0(%arg0: i32, %arg1: i32) -> (i32, i32) {
    %c0_i32 = arith.constant 0 : i32
    %c0_i32_0 = arith.constant 0 : i32
    return %arg0, %c0_i32 : i32, i32
  }
  func.func @transform_1(%arg0: i32, %arg1: i32) -> (i32, i32) {
    %c0_i32 = arith.constant 0 : i32
    %c0_i32_0 = arith.constant 0 : i32
    return %c0_i32, %arg1 : i32, i32
  }
  func.func @transform_2(%arg0: i32, %arg1: i32) -> (i32, i32) {
    %c0_i32 = arith.constant 0 : i32
    %c0_i32_0 = arith.constant 0 : i32
    return %c0_i32, %arg1 : i32, i32
  }
  func.func @transform_3(%arg0: i32, %arg1: i32) -> (i32, i32) {
    %c0_i32 = arith.constant 0 : i32
    return %arg0, %arg1 : i32, i32
  }
  func.func @transform_4(%arg0: i32, %arg1: i32) -> (i32, i32) {
    %c0_i32 = arith.constant 0 : i32
    %c0_i32_0 = arith.constant 0 : i32
    return %c0_i32, %arg1 : i32, i32
  }
  func.func @transform_5(%arg0: i32, %arg1: i32) -> (i32, i32) {
    %c0_i32 = arith.constant 0 : i32
    return %arg0, %arg1 : i32, i32
  }
}

module attributes {stable_mosaic.version = 11 : i64} {
  func.func @_fused_matmul_kernel(%arg0: i32, %arg1: i32, %arg2: memref<40x32xbf16, #tpu.memory_space<vmem>>, %arg3: memref<1x32xf32, #tpu.memory_space<vmem>>, %arg4: memref<1x32xf32, #tpu.memory_space<vmem>>, %arg5: memref<32x128xbf16, #tpu.memory_space<vmem>>, %arg6: memref<1x128xf32, #tpu.memory_space<vmem>>, %arg7: memref<40x128xbf16, #tpu.memory_space<vmem>>) attributes {dimension_semantics = [#tpu.dimension_semantics<parallel>, #tpu.dimension_semantics<parallel>], iteration_bounds = array<i64: 1, 1>, scalar_prefetch = 0 : i64, scratch_operands = 0 : i64, tpu.core_type = #tpu.core_type<tc>, window_params = [{transform_indices = @transform_0, window_bounds = array<i64: 40, 32>}, {pipeline_mode = #tpu.pipeline_mode<synchronous>, transform_indices = @transform_1, window_bounds = array<i64: 1, 32>}, {pipeline_mode = #tpu.pipeline_mode<synchronous>, transform_indices = @transform_2, window_bounds = array<i64: 1, 32>}, {transform_indices = @transform_3, window_bounds = array<i64: 32, 128>}, {transform_indices = @transform_4, window_bounds = array<i64: 1, 128>}, {transform_indices = @transform_5, window_bounds = array<i64: 40, 128>}]} {
    %c0 = arith.constant 0 : index
    %c0_0 = arith.constant 0 : index
    %0 = vector.load %arg2[%c0, %c0_0] : memref<40x32xbf16, #tpu.memory_space<vmem>>, vector<40x32xbf16>
    %1 = arith.extf %0 : vector<40x32xbf16> to vector<40x32xf32>
    %cst = arith.constant dense<0.000000e+00> : vector<40xf32>
    %2 = vector.multi_reduction <add>, %1, %cst [1] : vector<40x32xf32> to vector<40xf32>
    %3 = vector.shape_cast %2 : vector<40xf32> to vector<40x1xf32>
    %cst_1 = arith.constant 3.200000e+01 : f32
    %4 = vector.broadcast %cst_1 : f32 to vector<40x1xf32>
    %5 = arith.divf %3, %4 : vector<40x1xf32>
    %6 = vector.broadcast %5 : vector<40x1xf32> to vector<40x32xf32>
    %7 = arith.subf %1, %6 : vector<40x32xf32>
    %8 = arith.mulf %7, %7 : vector<40x32xf32>
    %cst_2 = arith.constant dense<0.000000e+00> : vector<40xf32>
    %9 = vector.multi_reduction <add>, %8, %cst_2 [1] : vector<40x32xf32> to vector<40xf32>
    %10 = vector.shape_cast %9 : vector<40xf32> to vector<40x1xf32>
    %cst_3 = arith.constant 3.200000e+01 : f32
    %11 = vector.broadcast %cst_3 : f32 to vector<40x1xf32>
    %12 = arith.divf %10, %11 : vector<40x1xf32>
    %13 = vector.broadcast %5 : vector<40x1xf32> to vector<40x32xf32>
    %14 = arith.subf %1, %13 : vector<40x32xf32>
    %cst_4 = arith.constant 9.99999997E-7 : f32
    %15 = vector.broadcast %cst_4 : f32 to vector<40x1xf32>
    %16 = arith.addf %12, %15 : vector<40x1xf32>
    %17 = math.rsqrt %16 : vector<40x1xf32>
    %18 = vector.broadcast %17 : vector<40x1xf32> to vector<40x32xf32>
    %19 = arith.mulf %14, %18 : vector<40x32xf32>
    %c0_5 = arith.constant 0 : index
    %c0_6 = arith.constant 0 : index
    %20 = vector.load %arg3[%c0_5, %c0_6] : memref<1x32xf32, #tpu.memory_space<vmem>>, vector<1x32xf32>
    %21 = vector.broadcast %20 : vector<1x32xf32> to vector<40x32xf32>
    %22 = arith.mulf %19, %21 : vector<40x32xf32>
    %c0_7 = arith.constant 0 : index
    %c0_8 = arith.constant 0 : index
    %23 = vector.load %arg4[%c0_7, %c0_8] : memref<1x32xf32, #tpu.memory_space<vmem>>, vector<1x32xf32>
    %24 = vector.broadcast %23 : vector<1x32xf32> to vector<40x32xf32>
    %25 = arith.addf %22, %24 : vector<40x32xf32>
    %26 = arith.truncf %25 : vector<40x32xf32> to vector<40x32xbf16>
    %c0_9 = arith.constant 0 : index
    %c0_10 = arith.constant 0 : index
    %27 = vector.load %arg5[%c0_9, %c0_10] : memref<32x128xbf16, #tpu.memory_space<vmem>>, vector<32x128xbf16>
    %cst_11 = arith.constant dense<0.000000e+00> : vector<40x128xf32>
    %28 = tpu.matmul %26, %27, %cst_11 {dimension_numbers = #tpu.dot_dimension_numbers<[1], [0], [0], [1], [0, 0, 1, 1], [], []>} : vector<40x32xbf16>, vector<32x128xbf16>, vector<40x128xf32> -> vector<40x128xf32>
    %c0_12 = arith.constant 0 : index
    %c0_13 = arith.constant 0 : index
    %29 = vector.load %arg6[%c0_12, %c0_13] : memref<1x128xf32, #tpu.memory_space<vmem>>, vector<1x128xf32>
    %30 = vector.broadcast %29 : vector<1x128xf32> to vector<40x128xf32>
    %31 = arith.addf %28, %30 : vector<40x128xf32>
    %cst_14 = arith.constant 5.000000e-01 : f32
    %32 = vector.broadcast %cst_14 : f32 to vector<40x128xf32>
    %33 = arith.mulf %32, %31 : vector<40x128xf32>
    %cst_15 = arith.constant 4.471500e-02 : f32
    %34 = vector.broadcast %cst_15 : f32 to vector<40x128xf32>
    %35 = arith.mulf %34, %31 : vector<40x128xf32>
    %36 = arith.mulf %35, %31 : vector<40x128xf32>
    %37 = arith.mulf %36, %31 : vector<40x128xf32>
    %38 = arith.addf %31, %37 : vector<40x128xf32>
    %cst_16 = arith.constant 0.797884583 : f32
    %39 = vector.broadcast %cst_16 : f32 to vector<40x128xf32>
    %40 = arith.mulf %39, %38 : vector<40x128xf32>
    %41 = math.tanh %40 : vector<40x128xf32>
    %cst_17 = arith.constant 1.000000e+00 : f32
    %42 = vector.broadcast %cst_17 : f32 to vector<40x128xf32>
    %43 = arith.addf %42, %41 : vector<40x128xf32>
    %44 = arith.mulf %33, %43 : vector<40x128xf32>
    %45 = arith.truncf %44 : vector<40x128xf32> to vector<40x128xbf16>
    %c0_18 = arith.constant 0 : index
    %c0_19 = arith.constant 0 : index
    %46 = vector.load %arg7[%c0_18, %c0_19] : memref<40x128xbf16, #tpu.memory_space<vmem>>, vector<40x128xbf16>
    tpu.vector_store %arg7[%c0_18, %c0_19], %45 {strides = array<i32>} : memref<40x128xbf16, #tpu.memory_space<vmem>>, vector<40x128xbf16>,
    return
  }
  func.func @transform_0(%arg0: i32, %arg1: i32) -> (i32, i32) {
    %c0_i32 = arith.constant 0 : i32
    %c0_i32_0 = arith.constant 0 : i32
    return %arg0, %c0_i32 : i32, i32
  }
  func.func @transform_1(%arg0: i32, %arg1: i32) -> (i32, i32) {
    %c0_i32 = arith.constant 0 : i32
    %c0_i32_0 = arith.constant 0 : i32
    %c0_i32_1 = arith.constant 0 : i32
    return %c0_i32, %c0_i32_0 : i32, i32
  }
  func.func @transform_2(%arg0: i32, %arg1: i32) -> (i32, i32) {
    %c0_i32 = arith.constant 0 : i32
    %c0_i32_0 = arith.constant 0 : i32
    %c0_i32_1 = arith.constant 0 : i32
    return %c0_i32, %c0_i32_0 : i32, i32
  }
  func.func @transform_3(%arg0: i32, %arg1: i32) -> (i32, i32) {
    %c0_i32 = arith.constant 0 : i32
    %c0_i32_0 = arith.constant 0 : i32
    return %c0_i32, %arg1 : i32, i32
  }
  func.func @transform_4(%arg0: i32, %arg1: i32) -> (i32, i32) {
    %c0_i32 = arith.constant 0 : i32
    %c0_i32_0 = arith.constant 0 : i32
    return %c0_i32, %arg1 : i32, i32
  }
  func.func @transform_5(%arg0: i32, %arg1: i32) -> (i32, i32) {
    %c0_i32 = arith.constant 0 : i32
    return %arg0, %arg1 : i32, i32
  }
}

module attributes {stable_mosaic.version = 11 : i64} {
  func.func @_fused_matmul_kernel(%arg0: i32, %arg1: i32, %arg2: memref<40x128xbf16, #tpu.memory_space<vmem>>, %arg3: memref<128x32xbf16, #tpu.memory_space<vmem>>, %arg4: memref<1x32xf32, #tpu.memory_space<vmem>>, %arg5: memref<40x32xbf16, #tpu.memory_space<vmem>>, %arg6: memref<1x32xf32, #tpu.memory_space<vmem>>, %arg7: memref<40x32xbf16, #tpu.memory_space<vmem>>) attributes {dimension_semantics = [#tpu.dimension_semantics<parallel>, #tpu.dimension_semantics<parallel>], iteration_bounds = array<i64: 1, 1>, scalar_prefetch = 0 : i64, scratch_operands = 0 : i64, tpu.core_type = #tpu.core_type<tc>, window_params = [{transform_indices = @transform_0, window_bounds = array<i64: 40, 128>}, {transform_indices = @transform_1, window_bounds = array<i64: 128, 32>}, {transform_indices = @transform_2, window_bounds = array<i64: 1, 32>}, {transform_indices = @transform_3, window_bounds = array<i64: 40, 32>}, {transform_indices = @transform_4, window_bounds = array<i64: 1, 32>}, {transform_indices = @transform_5, window_bounds = array<i64: 40, 32>}]} {
    %c0 = arith.constant 0 : index
    %c0_0 = arith.constant 0 : index
    %0 = vector.load %arg2[%c0, %c0_0] : memref<40x128xbf16, #tpu.memory_space<vmem>>, vector<40x128xbf16>
    %c0_1 = arith.constant 0 : index
    %c0_2 = arith.constant 0 : index
    %1 = vector.load %arg3[%c0_1, %c0_2] : memref<128x32xbf16, #tpu.memory_space<vmem>>, vector<128x32xbf16>
    %cst = arith.constant dense<0.000000e+00> : vector<40x32xf32>
    %2 = tpu.matmul %0, %1, %cst {dimension_numbers = #tpu.dot_dimension_numbers<[1], [0], [0], [1], [0, 0, 1, 1], [], []>} : vector<40x128xbf16>, vector<128x32xbf16>, vector<40x32xf32> -> vector<40x32xf32>
    %c0_3 = arith.constant 0 : index
    %c0_4 = arith.constant 0 : index
    %3 = vector.load %arg4[%c0_3, %c0_4] : memref<1x32xf32, #tpu.memory_space<vmem>>, vector<1x32xf32>
    %4 = vector.broadcast %3 : vector<1x32xf32> to vector<40x32xf32>
    %5 = arith.addf %2, %4 : vector<40x32xf32>
    %c0_5 = arith.constant 0 : index
    %c0_6 = arith.constant 0 : index
    %6 = vector.load %arg5[%c0_5, %c0_6] : memref<40x32xbf16, #tpu.memory_space<vmem>>, vector<40x32xbf16>
    %7 = arith.extf %6 : vector<40x32xbf16> to vector<40x32xf32>
    %c0_7 = arith.constant 0 : index
    %c0_8 = arith.constant 0 : index
    %8 = vector.load %arg6[%c0_7, %c0_8] : memref<1x32xf32, #tpu.memory_space<vmem>>, vector<1x32xf32>
    %9 = vector.broadcast %8 : vector<1x32xf32> to vector<40x32xf32>
    %10 = arith.mulf %9, %5 : vector<40x32xf32>
    %11 = arith.addf %7, %10 : vector<40x32xf32>
    %12 = arith.truncf %11 : vector<40x32xf32> to vector<40x32xbf16>
    %c0_9 = arith.constant 0 : index
    %c0_10 = arith.constant 0 : index
    %13 = vector.load %arg7[%c0_9, %c0_10] : memref<40x32xbf16, #tpu.memory_space<vmem>>, vector<40x32xbf16>
    tpu.vector_store %arg7[%c0_9, %c0_10], %12 {strides = array<i32>} : memref<40x32xbf16, #tpu.memory_space<vmem>>, vector<40x32xbf16>,
    return
  }
  func.func @transform_0(%arg0: i32, %arg1: i32) -> (i32, i32) {
    %c0_i32 = arith.constant 0 : i32
    %c0_i32_0 = arith.constant 0 : i32
    return %arg0, %c0_i32 : i32, i32
  }
  func.func @transform_1(%arg0: i32, %arg1: i32) -> (i32, i32) {
    %c0_i32 = arith.constant 0 : i32
    %c0_i32_0 = arith.constant 0 : i32
    return %c0_i32, %arg1 : i32, i32
  }
  func.func @transform_2(%arg0: i32, %arg1: i32) -> (i32, i32) {
    %c0_i32 = arith.constant 0 : i32
    %c0_i32_0 = arith.constant 0 : i32
    return %c0_i32, %arg1 : i32, i32
  }
  func.func @transform_3(%arg0: i32, %arg1: i32) -> (i32, i32) {
    %c0_i32 = arith.constant 0 : i32
    return %arg0, %arg1 : i32, i32
  }
  func.func @transform_4(%arg0: i32, %arg1: i32) -> (i32, i32) {
    %c0_i32 = arith.constant 0 : i32
    %c0_i32_0 = arith.constant 0 : i32
    return %c0_i32, %arg1 : i32, i32
  }
  func.func @transform_5(%arg0: i32, %arg1: i32) -> (i32, i32) {
    %c0_i32 = arith.constant 0 : i32
    return %arg0, %arg1 : i32, i32
  }
}

module attributes {stable_mosaic.version = 11 : i64} {
  func.func @_cls_ln_max_kernel(%arg0: i32, %arg1: memref<1x4x32xbf16, #tpu.memory_space<vmem>>, %arg2: memref<1x32xf32, #tpu.memory_space<vmem>>, %arg3: memref<1x32xf32, #tpu.memory_space<vmem>>, %arg4: memref<1x1x32xf32, #tpu.memory_space<vmem>>) attributes {dimension_semantics = [#tpu.dimension_semantics<parallel>], iteration_bounds = array<i64: 2>, scalar_prefetch = 0 : i64, scratch_operands = 0 : i64, tpu.core_type = #tpu.core_type<tc>, window_params = [{transform_indices = @transform_0, window_bounds = array<i64: 1, 4, 32>}, {pipeline_mode = #tpu.pipeline_mode<synchronous>, transform_indices = @transform_1, window_bounds = array<i64: 1, 32>}, {pipeline_mode = #tpu.pipeline_mode<synchronous>, transform_indices = @transform_2, window_bounds = array<i64: 1, 32>}, {transform_indices = @transform_3, window_bounds = array<i64: 1, 1, 32>}]} {
    %c0 = arith.constant 0 : index
    %c0_0 = arith.constant 0 : index
    %c0_1 = arith.constant 0 : index
    %0 = vector.load %arg1[%c0, %c0_0, %c0_1] : memref<1x4x32xbf16, #tpu.memory_space<vmem>>, vector<1x4x32xbf16>
    %1 = vector.shape_cast %0 : vector<1x4x32xbf16> to vector<4x32xbf16>
    %2 = arith.extf %1 : vector<4x32xbf16> to vector<4x32xf32>
    %cst = arith.constant dense<0.000000e+00> : vector<4xf32>
    %3 = vector.multi_reduction <add>, %2, %cst [1] : vector<4x32xf32> to vector<4xf32>
    %4 = vector.shape_cast %3 : vector<4xf32> to vector<4x1xf32>
    %cst_2 = arith.constant 3.200000e+01 : f32
    %5 = vector.broadcast %cst_2 : f32 to vector<4x1xf32>
    %6 = arith.divf %4, %5 : vector<4x1xf32>
    %7 = vector.broadcast %6 : vector<4x1xf32> to vector<4x32xf32>
    %8 = arith.subf %2, %7 : vector<4x32xf32>
    %9 = arith.mulf %8, %8 : vector<4x32xf32>
    %cst_3 = arith.constant dense<0.000000e+00> : vector<4xf32>
    %10 = vector.multi_reduction <add>, %9, %cst_3 [1] : vector<4x32xf32> to vector<4xf32>
    %11 = vector.shape_cast %10 : vector<4xf32> to vector<4x1xf32>
    %cst_4 = arith.constant 3.200000e+01 : f32
    %12 = vector.broadcast %cst_4 : f32 to vector<4x1xf32>
    %13 = arith.divf %11, %12 : vector<4x1xf32>
    %14 = vector.broadcast %6 : vector<4x1xf32> to vector<4x32xf32>
    %15 = arith.subf %2, %14 : vector<4x32xf32>
    %cst_5 = arith.constant 9.99999997E-7 : f32
    %16 = vector.broadcast %cst_5 : f32 to vector<4x1xf32>
    %17 = arith.addf %13, %16 : vector<4x1xf32>
    %18 = math.rsqrt %17 : vector<4x1xf32>
    %19 = vector.broadcast %18 : vector<4x1xf32> to vector<4x32xf32>
    %20 = arith.mulf %15, %19 : vector<4x32xf32>
    %c0_6 = arith.constant 0 : index
    %c0_7 = arith.constant 0 : index
    %21 = vector.load %arg2[%c0_6, %c0_7] : memref<1x32xf32, #tpu.memory_space<vmem>>, vector<1x32xf32>
    %22 = vector.broadcast %21 : vector<1x32xf32> to vector<4x32xf32>
    %23 = arith.mulf %20, %22 : vector<4x32xf32>
    %c0_8 = arith.constant 0 : index
    %c0_9 = arith.constant 0 : index
    %24 = vector.load %arg3[%c0_8, %c0_9] : memref<1x32xf32, #tpu.memory_space<vmem>>, vector<1x32xf32>
    %25 = vector.broadcast %24 : vector<1x32xf32> to vector<4x32xf32>
    %26 = arith.addf %23, %25 : vector<4x32xf32>
    %cst_10 = arith.constant dense<0xFF800000> : vector<32xf32>
    %27 = vector.multi_reduction <maximumf>, %26, %cst_10 [0] : vector<4x32xf32> to vector<32xf32>
    %28 = vector.shape_cast %27 : vector<32xf32> to vector<1x32xf32>
    %c0_11 = arith.constant 0 : index
    %c0_12 = arith.constant 0 : index
    %c0_13 = arith.constant 0 : index
    %29 = vector.load %arg4[%c0_11, %c0_12, %c0_13] : memref<1x1x32xf32, #tpu.memory_space<vmem>>, vector<1x1x32xf32>
    %30 = vector.shape_cast %29 : vector<1x1x32xf32> to vector<1x32xf32>
    %31 = vector.shape_cast %28 : vector<1x32xf32> to vector<1x1x32xf32>
    tpu.vector_store %arg4[%c0_11, %c0_12, %c0_13], %31 {strides = array<i32>} : memref<1x1x32xf32, #tpu.memory_space<vmem>>, vector<1x1x32xf32>,
    return
  }
  func.func @transform_0(%arg0: i32) -> (i32, i32, i32) {
    %c0_i32 = arith.constant 0 : i32
    %c0_i32_0 = arith.constant 0 : i32
    %c0_i32_1 = arith.constant 0 : i32
    return %arg0, %c0_i32, %c0_i32_0 : i32, i32, i32
  }
  func.func @transform_1(%arg0: i32) -> (i32, i32) {
    %c0_i32 = arith.constant 0 : i32
    %c0_i32_0 = arith.constant 0 : i32
    %c0_i32_1 = arith.constant 0 : i32
    return %c0_i32, %c0_i32_0 : i32, i32
  }
  func.func @transform_2(%arg0: i32) -> (i32, i32) {
    %c0_i32 = arith.constant 0 : i32
    %c0_i32_0 = arith.constant 0 : i32
    %c0_i32_1 = arith.constant 0 : i32
    return %c0_i32, %c0_i32_0 : i32, i32
  }
  func.func @transform_3(%arg0: i32) -> (i32, i32, i32) {
    %c0_i32 = arith.constant 0 : i32
    %c0_i32_0 = arith.constant 0 : i32
    %c0_i32_1 = arith.constant 0 : i32
    return %arg0, %c0_i32, %c0_i32_0 : i32, i32, i32
  }
}

</mosaic_0001>

<bundles_post_ra>
// kernel: _lambda_.12
= control target key start
LH: loop header
LB: loop body
LE: loop exit
PB: predicated region body
PF: predicated region fallthrough
CT: control target
= control target key end

     0   :  { %vm223_vm0 = vcmask 261120   ;;  %s414_s1 = inlined_call_operand.vmem [shape: bf16[256,32], index: 1, kind: input, shape index: {}]   ;;  %s415_s0 = inlined_call_operand.vmem [shape: bf16[32,256], index: 0, kind: input, shape index: {}]   ;;  %s416_s2 = inlined_call_operand.vmem [shape: f32[1,32], index: 2, kind: input, shape index: {}]   ;;  %s417_s3 = inlined_call_operand.vmem [shape: f32[32,32], index: 3, kind: output, shape index: {}]  }
   0x1   :  { %v297_v0 = vld [vmem:[%s414_s1 + $0x40] sm:$0xff]   ;;  %v299_v2 = vld [vmem:[%s414_s1 + $0x48] sm:$0xff]   ;;  %v301_v4 = vld [vmem:[%s414_s1 + $0x50] sm:$0xff]  }
   0x2   :  { %v298_v1 = vld [vmem:[%s414_s1] sm:$0xff]   ;;  %253 = vmatprep.subr.bf16.mxu0 %v297_v0  ;;  %281 = vmatprep.subr.bf16.mxu1 %v297_v0  ;;  %v300_v3 = vld [vmem:[%s414_s1 + $0x8] sm:$0xff]   ;;  %v302_v5 = vld [vmem:[%s414_s1 + $0x10] sm:$0xff]  }
   0x3   :  { %254 = vmatpush3.bf16.msra.mxu0 %v298_v1  ;;  %289 = vmatpush3.bf16.msra.mxu1 %v298_v1  ;;  %v303_v6 = vld [vmem:[%s414_s1 + $0x58] sm:$0xff]   ;;  %v305_v8 = vld [vmem:[%s414_s1 + $0x60] sm:$0xff]   ;;  %v307_v10 = vld [vmem:[%s414_s1 + $0x68] sm:$0xff]  }
   0x4   :  { %255 = vmatprep.subr.bf16.mxu0 %v299_v2  ;;  %282 = vmatprep.subr.bf16.mxu1 %v299_v2  ;;  %v304_v7 = vld [vmem:[%s414_s1 + $0x18] sm:$0xff]   ;;  %v306_v9 = vld [vmem:[%s414_s1 + $0x20] sm:$0xff]   ;;  %v308_v13 = vld [vmem:[%s414_s1 + $0x28] sm:$0xff]  }
   0x5   :  { %v315_v11 = vld [vmem:[%s415_s0 + $0x4] ss:$8 sps:$4 sm:$0xff]   ;;  %v318_v12 = vld [vmem:[%s415_s0 + $0x14] ss:$8 sps:$4 sm:$0xff]   ;;  %v313_v18 = vld [vmem:[%s415_s0] ss:$8 sps:$4 sm:$0xff]  }
   0x6   :  { %v309_v14 = vld [vmem:[%s414_s1 + $0x70] sm:$0xff]   ;;  %206 = vmatprep.mubr.bf16.mxu0 %v315_v11  ;;  %214 = vmatprep.mubr.bf16.mxu1 %v318_v12  ;;  %v311_v16 = vld [vmem:[%s414_s1 + $0x78] sm:$0xff]   ;;  %v232_v22 = vld [vmem:[%s416_s2] ss:$0 sm:$0xff] }
   0x7   :  { %256 = vmatpush3.bf16.msra.mxu0 %v300_v3  ;;  %290 = vmatpush3.bf16.msra.mxu1 %v300_v3  ;;  %v310_v15 = vld [vmem:[%s414_s1 + $0x30] sm:$0xff]   ;;  %v312_v17 = vld [vmem:[%s414_s1 + $0x38] sm:$0xff]  }
   0x8   :  { %257 = vmatprep.subr.bf16.mxu0 %v301_v4  ;;  %283 = vmatprep.subr.bf16.mxu1 %v301_v4  ;;  %v316_v19 = vld [vmem:[%s415_s0 + $0x10] ss:$8 sps:$4 sm:$0xff]  }
   0xb   :  { %258 = vmatpush3.bf16.msra.mxu0 %v302_v5  ;;  %291 = vmatpush3.bf16.msra.mxu1 %v302_v5 }
   0xc   :  { %259 = vmatprep.subr.bf16.mxu0 %v303_v6  ;;  %284 = vmatprep.subr.bf16.mxu1 %v303_v6 }
   0xf   :  { %260 = vmatpush3.bf16.msra.mxu0 %v304_v7  ;;  %292 = vmatpush3.bf16.msra.mxu1 %v304_v7 }
  0x10   :  { %261 = vmatprep.subr.bf16.mxu0 %v305_v8  ;;  %285 = vmatprep.subr.bf16.mxu1 %v305_v8 }
  0x13   :  { %262 = vmatpush3.bf16.msra.mxu0 %v306_v9  ;;  %293 = vmatpush3.bf16.msra.mxu1 %v306_v9 }
  0x14   :  { %263 = vmatprep.subr.bf16.mxu0 %v307_v10  ;;  %286 = vmatprep.subr.bf16.mxu1 %v307_v10 }
  0x17   :  { %264 = vmatpush3.bf16.msra.mxu0 %v308_v13  ;;  %294 = vmatpush3.bf16.msra.mxu1 %v308_v13 }
  0x18   :  { %265 = vmatprep.subr.bf16.mxu0 %v309_v14  ;;  %287 = vmatprep.subr.bf16.mxu1 %v309_v14 }
  0x1b   :  { %266 = vmatpush3.bf16.msra.mxu0 %v310_v15  ;;  %295 = vmatpush3.bf16.msra.mxu1 %v310_v15 }
  0x1c   :  { %267 = vmatprep.subr.bf16.mxu0 %v311_v16  ;;  %288 = vmatprep.subr.bf16.mxu1 %v311_v16 }
  0x1f   :  { %268 = vmatpush3.bf16.msra.mxu0 %v312_v17  ;;  %296 = vmatpush3.bf16.msra.mxu1 %v312_v17 }
  0x22   :  { %207 = vmatmul.mubr.bf16.vlgmr.msra.gmra.mrb[0].mxu0 %v313_v18  ;;  %215 = vmatmul.mubr.bf16.vlgmr.msra.gmra.mrb[0].mxu1 %v316_v19 }
  0xf5   :  { %v269_v20 = vpop.f32.mrb[0].mxu0  ;;  %v275_v21 = vpop.f32.mrb[0].mxu1 }
  0xf6   :  { %v270_v23 = vpop.f32.mrb[1].mxu0  ;;  %v276_v24 = vpop.f32.mrb[1].mxu1 }
  0xf7   :  { %v271_v25 = vadd.f32 %v270_v23, %v269_v20  ;;  %v277_v26 = vadd.f32 %v276_v24, %v275_v21  ;;  %v272_v27 = vpop.f32.mrb[2].mxu0  ;;  %v278_v28 = vpop.f32.mrb[2].mxu1 }
  0xf8   :  { %v273_v29 = vpop.f32.mrb[3].mxu0  ;;  %v279_v30 = vpop.f32.mrb[3].mxu1 }
  0xf9   :  { %v209_v31 = vadd.f32 %v271_v25, %v232_v22  ;;  %v217_v32 = vadd.f32 %v277_v26, %v232_v22  ;;  %v274_v33 = vadd.f32 %v273_v29, %v272_v27  ;;  %v280_v34 = vadd.f32 %v279_v30, %v278_v28 }
  0xfb   :  { %224 = vst.msk [vmem:[%s417_s3] sm:$0xff] %vm223_vm0, %v209_v31  ;;  %226 = vst.msk [vmem:[%s417_s3 + $0x10] sm:$0xff] %vm223_vm0, %v217_v32  ;;  %v212_v35 = vadd.f32 %v274_v33, %v232_v22  ;;  %v220_v36 = vadd.f32 %v280_v34, %v232_v22 }
  0xfd   :  { %225 = vst.msk [vmem:[%s417_s3 + $0x8] sm:$0xff] %vm223_vm0, %v212_v35  ;;  %227 = vst.msk [vmem:[%s417_s3 + $0x18] sm:$0xff] %vm223_vm0, %v220_v36 }

// kernel: _lambda_.13
= control target key start
LH: loop header
LB: loop body
LE: loop exit
PB: predicated region body
PF: predicated region fallthrough
CT: control target
= control target key end

     0   :  { %vm31_vm0 = vcmask 261120   ;;  %v310_v39 = vmov 0.0   ;;  %vm311_vm1 = vmmov 0   ;;  %vm234_vm2 = vcmask 781312   ;;  %s417_s0 = inlined_call_operand.vmem [shape: bf16[40,32], index: 0, kind: input, shape index: {}]   ;;  %s418_s3 = inlined_call_operand.vmem [shape: bf16[32,96], index: 3, kind: input, shape index: {}]   ;;  %s419_s1 = inlined_call_operand.vmem [shape: f32[1,32], index: 1, kind: input, shape index: {}]   ;;  %s420_s2 = inlined_call_operand.vmem [shape: f32[1,32], index: 2, kind: input, shape index: {}]   ;;  %s421_s4 = inlined_call_operand.vmem [shape: f32[1,96], index: 4, kind: input, shape index: {}]   ;;  %s422_s5 = inlined_call_operand.vmem [shape: bf16[40,96], index: 5, kind: output, shape index: {}]  }
   0x1   :  { %v270_v0 = vld [vmem:[%s417_s0 + $0x8] sm:$0xff]   ;;  %v263_v1 = vld [vmem:[%s417_s0] sm:$0xff]   ;;  %v25_v5 = vld [vmem:[%s417_s0 + $0x10] sm:$0xf]  ;;  %292 = vmatprep.subr.bf16.mxu1 %v310_v39  ;;  %276 = vmatprep.subr.bf16.mxu0 %v310_v39 }
   0x2   :  { %v268_v2 = vunpack.c.l.bf16 %v270_v0  ;;  %v269_v3 = vunpack.c.h.bf16 %v270_v0  ;;  %v264_v4 = vunpack.c.l.bf16 %v263_v1  ;;  %v265_v6 = vunpack.c.h.bf16 %v263_v1  ;;  %v298_v38 = vld [vmem:[%s418_s3] sm:$0xff]   ;;  %v299_v40 = vld [vmem:[%s418_s3 + $0x8] sm:$0xff]   ;;  %284 = vmatprep.mubr.msk.bf16.mxu1 %vm311_vm1, %v310_v39  ;;  %280 = vmatprep.mubr.msk.bf16.mxu0 %vm311_vm1, %v310_v39 }
   0x3   :  { %v30_v10 = vunpack.c.l.bf16 %v25_v5  ;;  %294 = vmatpush3.bf16.msra.mxu1 %v298_v38  ;;  %277 = vmatpush3.bf16.msra.mxu0 %v298_v38  ;;  %v244_v58 = vld [vmem:[%s419_s1] ss:$0 sm:$0xff] }
   0x4   :  { %v38_v7 = vsel %vm31_vm0, %v268_v2, 0.0  ;;  %v32_v8 = vsel %vm31_vm0, %v264_v4, 0.0  ;;  %v41_v9 = vsel %vm31_vm0, %v269_v3, 0.0  ;;  %v35_v11 = vsel %vm31_vm0, %v265_v6, 0.0  ;;  %293 = vmatprep.subr.bf16.mxu1 %v310_v39  ;;  %278 = vmatprep.subr.bf16.mxu0 %v310_v39  ;;  %v245_v0 = vld [vmem:[%s420_s2] ss:$0 sm:$0xff] }
   0x5   :  { %39 = vadd.xlane.f32.xlu0 %v38_v7  ;;  %33 = vadd.xlane.f32.xlu1 %v32_v8  ;;  %v44_v12 = vsel %vm31_vm0, %v30_v10, 0.0 }
   0x7   :  { %295 = vmatpush3.bf16.msra.mxu1 %v299_v40  ;;  %279 = vmatpush3.bf16.msra.mxu0 %v299_v40 }
   0x9   :  { %42 = vadd.xlane.f32.xlu0 %v41_v9  ;;  %36 = vadd.xlane.f32.xlu1 %v35_v11 }
   0xd   :  { %45 = vadd.xlane.f32.xlu0 %v44_v12 }
  0x92   :  { %v40_v13 = vpop.xlane.xlu0 %39  ;;  %v34_v14 = vpop.xlane.xlu1 %33 }
  0x93   :  { %v50_v15 = vmul.f32 0.03125, %v40_v13  ;;  %v48_v16 = vmul.f32 0.03125, %v34_v14 }
  0x95   :  { %v356_v17 = vsub.f32 %v268_v2, %v50_v15  ;;  %v358_v18 = vsub.f32 %v264_v4, %v48_v16 }
  0x96   :  { %v43_v19 = vpop.xlane.xlu0 %42  ;;  %v37_v20 = vpop.xlane.xlu1 %36 }
  0x97   :  { %v51_v21 = vmul.f32 0.03125, %v43_v19  ;;  %v60_v22 = vmul.f32 %v356_v17, %v356_v17  ;;  %v49_v23 = vmul.f32 0.03125, %v37_v20  ;;  %v58_v24 = vmul.f32 %v358_v18, %v358_v18 }
  0x99   :  { %v56_v25 = vsub.f32 %v269_v3, %v51_v21  ;;  %v69_v26 = vsel %vm31_vm0, %v60_v22, 0.0  ;;  %v365_v27 = vsub.f32 %v265_v6, %v49_v23  ;;  %v63_v31 = vsel %vm31_vm0, %v58_v24, 0.0 }
  0x9a   :  { %v46_v28 = vpop.xlane.xlu0 %45  ;;  %70 = vadd.xlane.f32.xlu1 %v69_v26 }
  0x9b   :  { %v52_v29 = vmul.f32 0.03125, %v46_v28  ;;  %v61_v30 = vmul.f32 %v56_v25, %v56_v25  ;;  %v59_v32 = vmul.f32 %v365_v27, %v365_v27 }
  0x9d   :  { %v57_v33 = vsub.f32 %v30_v10, %v52_v29  ;;  %v72_v34 = vsel %vm31_vm0, %v61_v30, 0.0  ;;  %v66_v36 = vsel %vm31_vm0, %v59_v32, 0.0 }
  0x9e   :  { %73 = vadd.xlane.f32.xlu0 %v72_v34  ;;  %64 = vadd.xlane.f32.xlu1 %v63_v31 }
  0x9f   :  { %v62_v35 = vmul.f32 %v57_v33, %v57_v33 }
  0xa1   :  { %v75_v37 = vsel %vm31_vm0, %v62_v35, 0.0 }
  0xa2   :  { %76 = vadd.xlane.f32.xlu1 %v75_v37  ;;  %67 = vadd.xlane.f32.xlu0 %v66_v36 }
 0x127   :  { %v71_v41 = vpop.xlane.xlu1 %70 }
 0x128   :  { %v80_v42 = vmul.f32 0.03125, %v71_v41 }
 0x12a   :  { %v85_v43 = vadd.f32 1e-06, %v80_v42 }
 0x12b   :  { %v74_v44 = vpop.xlane.xlu0 %73  ;;  %v65_v45 = vpop.xlane.xlu1 %64 }
 0x12c   :  { %300 = vrsqrt.f32 %v85_v43  ;;  %v81_v46 = vmul.f32 0.03125, %v74_v44  ;;  %v78_v47 = vmul.f32 0.03125, %v65_v45 }
 0x12e   :  { %v86_v48 = vadd.f32 1e-06, %v81_v46  ;;  %v83_v49 = vadd.f32 1e-06, %v78_v47 }
 0x12f   :  { %v68_v50 = vpop.xlane.xlu0 %67  ;;  %v77_v51 = vpop.xlane.xlu1 %76 }
 0x130   :  { %302 = vrsqrt.f32 %v86_v48  ;;  %v79_v52 = vmul.f32 0.03125, %v68_v50  ;;  %v82_v53 = vmul.f32 0.03125, %v77_v51 }
 0x131   :  { %304 = vrsqrt.f32 %v83_v49 }
 0x132   :  { %v84_v54 = vadd.f32 1e-06, %v79_v52  ;;  %v87_v55 = vadd.f32 1e-06, %v82_v53 }
 0x134   :  { %306 = vrsqrt.f32 %v84_v54 }
 0x135   :  { %308 = vrsqrt.f32 %v87_v55 }
 0x136   :  { %v301_v56 = vpop.eup %300 }
 0x137   :  { %v95_v57 = vmul.f32 %v301_v56, %v356_v17  ;;  %v246_v17 = vld [vmem:[%s421_s4] ss:$0 sm:$0xff] }
 0x139   :  { %v107_v62 = vmul.f32 %v244_v58, %v95_v57 }
 0x13a   :  { %v303_v59 = vpop.eup %302 }
 0x13b   :  { %v305_v60 = vpop.eup %304  ;;  %v96_v61 = vmul.f32 %v303_v59, %v56_v25  ;;  %v119_v5 = vadd.f32 %v245_v0, %v107_v62 }
 0x13c   :  { %v93_v63 = vmul.f32 %v305_v60, %v358_v18 }
 0x13d   :  { %v108_v1 = vmul.f32 %v244_v58, %v96_v61 }
 0x13e   :  { %v307_v2 = vpop.eup %306  ;;  %v105_v7 = vmul.f32 %v244_v58, %v93_v63 }
 0x13f   :  { %v309_v3 = vpop.eup %308  ;;  %v94_v4 = vmul.f32 %v307_v2, %v365_v27  ;;  %v120_v6 = vadd.f32 %v245_v0, %v108_v1 }
 0x140   :  { %v97_v8 = vmul.f32 %v309_v3, %v57_v33  ;;  %v117_v12 = vadd.f32 %v245_v0, %v105_v7 }
 0x141   :  { %v123_v9 = vpack.c.bf16 %v120_v6, %v119_v5  ;;  %v106_v10 = vmul.f32 %v244_v58, %v94_v4 }
 0x142   :  { %v109_v11 = vmul.f32 %v244_v58, %v97_v8 }
 0x143   :  { %285 = vmatmul.mubr.msk.bf16.vlgmr.msra.gmra.mrb[0].mxu1 %vm31_vm0, %v123_v9  ;;  %v118_v13 = vadd.f32 %v245_v0, %v106_v10 }
 0x144   :  { %288 = vmatprep.mubr.msk.bf16.mxu1 %vm311_vm1, %v310_v39  ;;  %v121_v15 = vadd.f32 %v245_v0, %v109_v11 }
 0x145   :  { %v122_v14 = vpack.c.bf16 %v118_v13, %v117_v12 }
 0x146   :  { %v124_v16 = vpack.c.bf16 %v121_v15, %v121_v15 }
 0x147   :  { %281 = vmatmul.mubr.msk.bf16.vlgmr.msra.gmra.mrb[0].mxu0 %vm31_vm0, %v122_v14 }
 0x14b   :  { %289 = vmatmul.mubr.msk.bf16.gmra.mrb[4].mxu1 %vm31_vm0, %v124_v16 }
 0x216   :  { %v199_v18 = vpop.f32.mrb[0].mxu1 }
 0x217   :  { %v200_v19 = vadd.f32 %v246_v17, %v199_v18  ;;  %v286_v20 = vpop.f32.mrb[1].mxu1 }
 0x218   :  { %v202_v21 = vpop.f32.mrb[2].mxu1 }
 0x219   :  { %v259_v22 = vpack.c.bf16 %v200_v19, %v200_v19  ;;  %v203_v23 = vadd.f32 %v246_v17, %v202_v21  ;;  %v287_v24 = vpop.f32.mrb[3].mxu1 }
 0x21a   :  { %v191_v25 = vpop.f32.mrb[0].mxu0 }
 0x21b   :  { %237 = vst.msk [vmem:[%s422_s5 + $0x8] sm:$0xf] %vm234_vm2, %v259_v22  ;;  %v260_v26 = vpack.c.bf16 %v203_v23, %v203_v23  ;;  %v192_v27 = vadd.f32 %v246_v17, %v191_v25  ;;  %v282_v28 = vpop.f32.mrb[1].mxu0 }
 0x21c   :  { %v194_v29 = vpop.f32.mrb[2].mxu0 }
 0x21d   :  { %238 = vst.msk [vmem:[%s422_s5 + $0xc] sm:$0xf] %vm234_vm2, %v260_v26  ;;  %v257_v30 = vpack.c.bf16 %v192_v27, %v192_v27  ;;  %v195_v31 = vadd.f32 %v246_v17, %v194_v29  ;;  %v283_v32 = vpop.f32.mrb[3].mxu0 }
 0x21e   :  { %v207_v33 = vpop.f32.mrb[4].mxu1 }
 0x21f   :  { %235 = vst.msk [vmem:[%s422_s5] sm:$0xf] %vm234_vm2, %v257_v30  ;;  %v258_v34 = vpack.c.bf16 %v195_v31, %v195_v31  ;;  %v208_v35 = vadd.f32 %v246_v17, %v207_v33  ;;  %v290_v36 = vpop.f32.mrb[5].mxu1 }
 0x220   :  { %v210_v37 = vpop.f32.mrb[6].mxu1 }
 0x221   :  { %236 = vst.msk [vmem:[%s422_s5 + $0x4] sm:$0xf] %vm234_vm2, %v258_v34  ;;  %v261_v38 = vpack.c.bf16 %v208_v35, %v208_v35  ;;  %v291_v39 = vpop.f32.mrb[7].mxu1 }
 0x223   :  { %239 = vst.msk [vmem:[%s422_s5 + $0x10] sm:$0xf] %vm234_vm2, %v261_v38 }

// kernel: _lambda_.14
= control target key start
LH: loop header
LB: loop body
LE: loop exit
PB: predicated region body
PF: predicated region fallthrough
CT: control target
= control target key end

     0   :  { %s515_s6 = smov 0   ;;  %s568_s0 = inlined_call_operand.vmem [shape: bf16[8,5,96], index: 0, kind: input, shape index: {}]   ;;  %s569_s1 = inlined_call_operand.vmem [shape: bf16[8,5,32], index: 1, kind: output, shape index: {}]  }
   0x1 LB: > { %s414_s7 = sadd.s32 4294967295, %s494_s6   ;;  %p418_p0 = scmp.ge.s32.totalorder %s494_s6, 1  ;;  %s494_s6 = sphi %s515_s6, %s11_s6  }
   0x2   : > { %p86_p1 = scmp.lt.s32.totalorder %s494_s6, 9 }
   0x4   : > { %p87_p2 = pnand %p418_p0, %p86_p1 }
   0x5   : > { %p104_p3 = scmp.lt.s32.totalorder (!%p87_p2), %s414_s7, 7  ;;  %v496_v0 = vmov (!%p87_p2), 0.0   ;;  %vm497_vm0 = vmmov (!%p87_p2), 0   ;;  %s498_s12 = smov (!%p87_p2), 96   ;;  %vm119_vm1 = vcmask (!%p87_p2), 130048   ;;  %vm166_vm2 = vcmask (!%p87_p2), 36864  }
   0x6   : > { %90 = sbr.rel (%p87_p2) target bundleno = 1537 (0x601), region = 24  ;;  %438 = vmatprep.subr.bf16.mxu0 (!%p87_p2), %v496_v0  ;;  %440 = vmatprep.mubr.msk.bf16.mxu0 (!%p87_p2), %vm497_vm0, %v496_v0  ;;  %s499_s13 = smov (!%p87_p2), 64   ;;  %vm185_vm3 = vcmask (!%p87_p2), 1041408   ;;  %vm186_vm4 = vcmask (!%p87_p2), 1042432   ;;  %v500_v11 = vmov (!%p87_p2), 65535   ;;  %vm181_vm5 = vcmask (!%p87_p2), 39936  }
   0x7   : > { %444 = vmatprep.subr.bf16.mxu1 (!%p87_p2), %v496_v0  ;;  %446 = vmatprep.mubr.msk.bf16.mxu1 (!%p87_p2), %vm497_vm0, %v496_v0  ;;  %v187_v12 = vsel (!%p87_p2), %vm185_vm3, 4294967295, %v500_v11  ;;  %s501_s14 = smov (!%p87_p2), 80   ;;  %s502_s15 = smov (!%p87_p2), 112   ;;  %vm233_vm6 = vcmask (!%p87_p2), 124928   ;;  %vm234_vm7 = vsmask.f32 (!%p87_p2), 2304 }
   0x8   : > { %v188_v13 = vsel (!%p87_p2), %vm186_vm4, %v187_v12, 0  ;;  %vm235_vm8 = vmand (!%p87_p2), %vm233_vm6, %vm234_vm7  ;;  %s503_s19 = smov (!%p87_p2), 48   ;;  %s504_s20 = smov (!%p87_p2), 16   ;;  %vm356_vm9 = vcmask (!%p87_p2), 256128  }
   0x9   : > { %vm357_vm10 = vmand (!%p87_p2), %vm356_vm9, %vm234_vm7 }
   0xd   : > { %s571_s7 = smov (!%p104_p3, %s414_s7), 7 }
   0xe   : > { %s419_s8 = sshll.u32 %s571_s7, 2 }
   0xf   : > { %s107_s11 = scalar_lea.vmem %s568_s0, %s419_s8  ;;  %s553_s18 = scalar_lea.vmem %s569_s1, %s419_s8 }
  0x10   : > { %v113_v1 = vld [vmem:[%s107_s11] sm:$0x7] }
  0x11   : > { %v533_v2 = vcombine.low %v113_v1, %v113_v1  ;;  %v236_v28 = vld [vmem:[%s553_s18] sm:$0x7] }
  0x13   : > { %117 = vrot.lane.b32.xlu0 %v533_v2, %s498_s12  ;;  %179 = vrot.lane.b32.xlu1 %v533_v2, %s499_s13 }
  0x85   : > { %v118_v3 = vpop.permute.xlu0 %117  ;;  %v180_v10 = vpop.permute.xlu1 %179 }
  0x86   : > { %v124_v4 = vsel %vm119_vm1, %v118_v3, 0  ;;  %v190_v14 = vand.u32 %v188_v13, %v180_v10 }
  0x87   : > { %439 = vmatpush3.bf16.xpose.msra.mxu0 %v124_v4 }
  0x88   : > { %456 = vmatprep.subr.bf16.mxu0 %v496_v0  ;;  %445 = vmatpush3.bf16.msra.mxu1 %v190_v14 }
  0x89   : > { %450 = vmatprep.subr.bf16.mxu1 %v496_v0 }
  0x8e   : > { %441 = vmatmul.mubr.msk.bf16.vlgmr.msra.gmra.mrb[0].mxu0 %vm119_vm1, %v113_v1 }
  0x8f   : > { %458 = vmatprep.mubr.msk.bf16.mxu0 %vm497_vm0, %v496_v0 }
 0x161   : > { %v160_v5 = vpop.f32.mrb[0].mxu0 }
 0x162   : > { %v442_v6 = vpop.f32.mrb[1].mxu0  ;;  %v167_v7 = vsel %vm166_vm2, %v160_v5, -inf }
 0x163   : > { %168 = vmax.xlane.f32.xlu0 %v167_v7  ;;  %v163_v8 = vpop.f32.mrb[2].mxu0 }
 0x164   : > { %v443_v9 = vpop.f32.mrb[3].mxu0 }
 0x1f0   : > { %v169_v15 = vpop.xlane.xlu0 %168 }
 0x1f1   : > { %v170_v16 = vsub.f32 %v160_v5, %v169_v15 }
 0x1f3   : > { %v171_v17 = vmul.f32 1.442695, %v170_v16 }
 0x1f5   : > { %480 = vpow2.f32 %v171_v17 }
 0x1ff   : > { %v481_v18 = vpop.eup %480 }
 0x200   : > { %v173_v19 = vsel %vm166_vm2, %v481_v18, 0.0 }
 0x201   : > { %174 = vadd.xlane.f32.xlu1 %v173_v19 }
 0x212   : > { %241 = vrot.lane.b32.xlu1 %v533_v2, %s501_s14 }
 0x216   : > { %239 = vrot.lane.b32.xlu1 %v533_v2, %s502_s15 }
 0x28e   : > { %v175_v20 = vpop.xlane.xlu1 %174 }
 0x28f   : > { %482 = vrcp.f32 %v175_v20 }
 0x292   : > { %v242_v22 = vpop.permute.xlu1 %241 }
 0x293   : > { %v247_v24 = vsel %vm119_vm1, %v242_v22, 0 }
 0x296   : > { %v240_v26 = vpop.permute.xlu1 %239 }
 0x299   : > { %v483_v21 = vpop.eup %482 }
 0x29a   : > { %v177_v23 = vmul.f32 %v483_v21, %v481_v18 }
 0x29c   : > { %v178_v25 = vpack.c.bf16 %v177_v23, %v177_v23 }
 0x29e   : > { %447 = vmatmul.mubr.msk.bf16.vlgmr.msra.gmra.mrb[0].mxu1 %vm181_vm5, %v178_v25 }
 0x29f   : > { %451 = vmatpush3.bf16.xpose.msra.mxu1 %v247_v24  ;;  %452 = vmatprep.mubr.msk.bf16.mxu1 %vm497_vm0, %v496_v0 }
 0x2a6   : > { %453 = vmatmul.mubr.msk.bf16.vlgmr.msra.gmra.mrb[4].mxu1 %vm119_vm1, %v240_v26 }
 0x371   : > { %v226_v27 = vpop.f32.mrb[0].mxu1 }
 0x372   : > { %v232_v29 = vpack.c.bf16 %v226_v27, %v226_v27  ;;  %v448_v30 = vpop.f32.mrb[1].mxu1 }
 0x373   : > { %v229_v31 = vpop.f32.mrb[2].mxu1 }
 0x374   : > { %v237_v32 = vsel %vm235_vm8, %v232_v29, %v236_v28  ;;  %v449_v33 = vpop.f32.mrb[3].mxu1 }
 0x375   : > { %238 = vst [vmem:[%s553_s18] sm:$0x7] %v237_v32 }
 0x379   : > { %v283_v34 = vpop.f32.mrb[4].mxu1 }
 0x37a   : > { %v454_v35 = vpop.f32.mrb[5].mxu1  ;;  %v289_v36 = vsel %vm166_vm2, %v283_v34, -inf }
 0x37b   : > { %290 = vmax.xlane.f32.xlu1 %v289_v36  ;;  %v286_v37 = vpop.f32.mrb[6].mxu1 }
 0x37c   : > { %v455_v38 = vpop.f32.mrb[7].mxu1  ;;  %v358_v55 = vld [vmem:[%s553_s18] sm:$0x7] }
 0x408   : > { %v291_v39 = vpop.xlane.xlu1 %290 }
 0x409   : > { %v292_v40 = vsub.f32 %v283_v34, %v291_v39 }
 0x40b   : > { %v293_v41 = vmul.f32 1.442695, %v292_v40 }
 0x40d   : > { %484 = vpow2.f32 %v293_v41 }
 0x417   : > { %v485_v42 = vpop.eup %484 }
 0x418   : > { %v295_v43 = vsel %vm166_vm2, %v485_v42, 0.0 }
 0x419   : > { %296 = vadd.xlane.f32.xlu0 %v295_v43 }
 0x42f   : > { %301 = vrot.lane.b32.xlu0 %v533_v2, %s503_s19 }
 0x4a6   : > { %v297_v44 = vpop.xlane.xlu0 %296 }
 0x4a7   : > { %486 = vrcp.f32 %v297_v44 }
 0x4aa   : > { %v302_v45 = vpop.permute.xlu0 %301 }
 0x4ab   : > { %v307_v46 = vand.u32 %v302_v45, %v188_v13 }
 0x4ad   : > { %457 = vmatpush3.bf16.msra.mxu0 %v307_v46 }
 0x4b1   : > { %v487_v47 = vpop.eup %486 }
 0x4b2   : > { %v299_v48 = vmul.f32 %v487_v47, %v485_v42 }
 0x4b4   : > { %v300_v49 = vpack.c.bf16 %v299_v48, %v299_v48 }
 0x4b6   : > { %459 = vmatmul.mubr.msk.bf16.vlgmr.msra.gmra.mrb[4].mxu0 %vm181_vm5, %v300_v49 }
 0x589   : > { %v343_v50 = vpop.f32.mrb[4].mxu0 }
 0x58a   : > { %v429_v51 = vpack.c.bf16 %v343_v50, %v343_v50  ;;  %v460_v52 = vpop.f32.mrb[5].mxu0 }
 0x58b   : > { %v346_v53 = vpop.f32.mrb[6].mxu0 }
 0x58c   : > { %353 = vrot.lane.b32.xlu0 %v429_v51, %s504_s20  ;;  %v461_v54 = vpop.f32.mrb[7].mxu0 }
 0x5fe   : > { %v354_v56 = vpop.permute.xlu0 %353 }
 0x5ff   : > { %v359_v57 = vsel %vm357_vm10, %v354_v56, %v358_v55 }
 0x600   : > { %360 = vst [vmem:[%s553_s18] sm:$0x7] %v359_v57 }
 0x601 PF: > { %s11_s6 = sadd.s32 1, %s494_s6  }
 0x602   : > { %p8_p4 = scmp.ge.s32.totalorder %s11_s6, 10  }
 0x604   :  { %10 = sbr.rel (!%p8_p4) target bundleno = 1 (0x1), region = 54 }

// kernel: _lambda_.15
= control target key start
LH: loop header
LB: loop body
LE: loop exit
PB: predicated region body
PF: predicated region fallthrough
CT: control target
= control target key end

     0   :  { %v247_v0 = vmov 0.0   ;;  %vm248_vm0 = vmmov 0   ;;  %vm62_vm1 = vcmask 261120   ;;  %vm176_vm2 = vcmask 257024   ;;  %s332_s1 = inlined_call_operand.vmem [shape: bf16[32,32], index: 1, kind: input, shape index: {}]   ;;  %s333_s0 = inlined_call_operand.vmem [shape: bf16[40,32], index: 0, kind: input, shape index: {}]   ;;  %s334_s2 = inlined_call_operand.vmem [shape: f32[1,32], index: 2, kind: input, shape index: {}]   ;;  %s335_s3 = inlined_call_operand.vmem [shape: bf16[40,32], index: 3, kind: input, shape index: {}]   ;;  %s336_s4 = inlined_call_operand.vmem [shape: f32[1,32], index: 4, kind: input, shape index: {}]   ;;  %s337_s5 = inlined_call_operand.vmem [shape: bf16[40,32], index: 5, kind: output, shape index: {}]  }
   0x1   :  { %236 = vmatprep.subr.bf16.mxu1 %v247_v0  ;;  %v242_v1 = vld [vmem:[%s332_s1] sm:$0xff]   ;;  %220 = vmatprep.subr.bf16.mxu0 %v247_v0  ;;  %v243_v2 = vld [vmem:[%s332_s1 + $0x8] sm:$0xff]   ;;  %v246_v5 = vld [vmem:[%s333_s0 + $0x10] ss:$0 sps:$4 sm:$0xff]  }
   0x2   :  { %228 = vmatprep.mubr.msk.bf16.mxu1 %vm248_vm0, %v247_v0  ;;  %224 = vmatprep.mubr.msk.bf16.mxu0 %vm248_vm0, %v247_v0  ;;  %v244_v3 = vld [vmem:[%s333_s0 + $0x8] sm:$0xff]   ;;  %v245_v4 = vld [vmem:[%s333_s0] sm:$0xff]   ;;  %v132_v32 = vld [vmem:[%s335_s3 + $0x10] sm:$0xf] }
   0x3   :  { %238 = vmatpush3.bf16.msra.mxu1 %v242_v1  ;;  %221 = vmatpush3.bf16.msra.mxu0 %v242_v1  ;;  %v186_v6 = vld [vmem:[%s334_s2] ss:$0 sm:$0xff]  ;;  %v214_v7 = vld [vmem:[%s335_s3 + $0x8] sm:$0xff]   ;;  %v137_v41 = vunpack.c.l.bf16 %v132_v32 }
   0x4   :  { %237 = vmatprep.subr.bf16.mxu1 %v247_v0  ;;  %222 = vmatprep.subr.bf16.mxu0 %v247_v0  ;;  %v207_v8 = vld [vmem:[%s335_s3] sm:$0xff]   ;;  %v212_v13 = vunpack.c.l.bf16 %v214_v7  ;;  %v213_v19 = vunpack.c.h.bf16 %v214_v7 }
   0x5   :  { %v195_v10 = vld [vmem:[%s336_s4] ss:$0 sm:$0xff]  ;;  %v208_v16 = vunpack.c.l.bf16 %v207_v8  ;;  %v209_v21 = vunpack.c.h.bf16 %v207_v8 }
   0x7   :  { %239 = vmatpush3.bf16.msra.mxu1 %v243_v2  ;;  %223 = vmatpush3.bf16.msra.mxu0 %v243_v2 }
   0xa   :  { %229 = vmatmul.mubr.msk.bf16.vlgmr.msra.gmra.mrb[0].mxu1 %vm62_vm1, %v244_v3  ;;  %225 = vmatmul.mubr.msk.bf16.vlgmr.msra.gmra.mrb[0].mxu0 %vm62_vm1, %v245_v4 }
   0xb   :  { %232 = vmatprep.mubr.msk.bf16.mxu1 %vm248_vm0, %v247_v0 }
  0x12   :  { %233 = vmatmul.mubr.msk.bf16.gmra.mrb[4].mxu1 %vm62_vm1, %v246_v5 }
  0xdd   :  { %v114_v9 = vpop.f32.mrb[0].mxu1  ;;  %v106_v11 = vpop.f32.mrb[0].mxu0 }
  0xde   :  { %v115_v12 = vadd.f32 %v186_v6, %v114_v9  ;;  %v230_v14 = vpop.f32.mrb[1].mxu1  ;;  %v107_v15 = vadd.f32 %v186_v6, %v106_v11  ;;  %v226_v17 = vpop.f32.mrb[1].mxu0 }
  0xdf   :  { %v117_v18 = vpop.f32.mrb[2].mxu1  ;;  %v109_v20 = vpop.f32.mrb[2].mxu0 }
  0xe0   :  { %v147_v22 = vmul.f32 %v195_v10, %v115_v12  ;;  %v118_v23 = vadd.f32 %v186_v6, %v117_v18  ;;  %v145_v24 = vmul.f32 %v195_v10, %v107_v15  ;;  %v231_v25 = vpop.f32.mrb[3].mxu1  ;;  %v110_v26 = vadd.f32 %v186_v6, %v109_v20  ;;  %v227_v27 = vpop.f32.mrb[3].mxu0 }
  0xe2   :  { %v152_v28 = vadd.f32 %v212_v13, %v147_v22  ;;  %v148_v29 = vmul.f32 %v195_v10, %v118_v23  ;;  %v150_v30 = vadd.f32 %v208_v16, %v145_v24  ;;  %v146_v31 = vmul.f32 %v195_v10, %v110_v26 }
  0xe4   :  { %v203_v33 = vpack.c.bf16 %v152_v28, %v152_v28  ;;  %v153_v34 = vadd.f32 %v213_v19, %v148_v29  ;;  %v201_v35 = vpack.c.bf16 %v150_v30, %v150_v30  ;;  %v151_v36 = vadd.f32 %v209_v21, %v146_v31 }
  0xe5   :  { %v122_v37 = vpop.f32.mrb[4].mxu1 }
  0xe6   :  { %179 = vst.msk [vmem:[%s337_s5 + $0x8] sm:$0xf] %vm176_vm2, %v203_v33  ;;  %v204_v38 = vpack.c.bf16 %v153_v34, %v153_v34  ;;  %177 = vst.msk [vmem:[%s337_s5] sm:$0xf] %vm176_vm2, %v201_v35  ;;  %v202_v39 = vpack.c.bf16 %v151_v36, %v151_v36  ;;  %v123_v40 = vadd.f32 %v186_v6, %v122_v37  ;;  %v234_v42 = vpop.f32.mrb[5].mxu1 }
  0xe7   :  { %v125_v43 = vpop.f32.mrb[6].mxu1 }
  0xe8   :  { %180 = vst.msk [vmem:[%s337_s5 + $0xc] sm:$0xf] %vm176_vm2, %v204_v38  ;;  %178 = vst.msk [vmem:[%s337_s5 + $0x4] sm:$0xf] %vm176_vm2, %v202_v39  ;;  %v149_v44 = vmul.f32 %v195_v10, %v123_v40  ;;  %v235_v45 = vpop.f32.mrb[7].mxu1 }
  0xea   :  { %v154_v46 = vadd.f32 %v149_v44, %v137_v41 }
  0xec   :  { %v205_v47 = vpack.c.bf16 %v154_v46, %v154_v46 }
  0xee   :  { %181 = vst.msk [vmem:[%s337_s5 + $0x10] sm:$0xf] %vm176_vm2, %v205_v47 }

// kernel: _lambda_.16
= control target key start
LH: loop header
LB: loop body
LE: loop exit
PB: predicated region body
PF: predicated region fallthrough
CT: control target
= control target key end

     0   :  { %vm31_vm0 = vcmask 261120   ;;  %v375_v39 = vmov 0.0   ;;  %vm376_vm1 = vmmov 0   ;;  %s471_s0 = inlined_call_operand.vmem [shape: bf16[40,32], index: 0, kind: input, shape index: {}]   ;;  %s472_s3 = inlined_call_operand.vmem [shape: bf16[32,128], index: 3, kind: input, shape index: {}]   ;;  %s473_s1 = inlined_call_operand.vmem [shape: f32[1,32], index: 1, kind: input, shape index: {}]   ;;  %s474_s2 = inlined_call_operand.vmem [shape: f32[1,32], index: 2, kind: input, shape index: {}]   ;;  %s475_s4 = inlined_call_operand.vmem [shape: f32[1,128], index: 4, kind: input, shape index: {}]   ;;  %s476_s5 = inlined_call_operand.vmem [shape: bf16[40,128], index: 5, kind: output, shape index: {}]  }
   0x1   :  { %v324_v0 = vld [vmem:[%s471_s0 + $0x8] sm:$0xff]   ;;  %v307_v1 = vld [vmem:[%s471_s0] sm:$0xff]   ;;  %v25_v5 = vld [vmem:[%s471_s0 + $0x10] sm:$0xf]  ;;  %347 = vmatprep.subr.bf16.mxu1 %v375_v39  ;;  %331 = vmatprep.subr.bf16.mxu0 %v375_v39 }
   0x2   :  { %v312_v2 = vunpack.c.l.bf16 %v324_v0  ;;  %v313_v3 = vunpack.c.h.bf16 %v324_v0  ;;  %v308_v4 = vunpack.c.l.bf16 %v307_v1  ;;  %v309_v6 = vunpack.c.h.bf16 %v307_v1  ;;  %v353_v38 = vld [vmem:[%s472_s3] sm:$0xff]   ;;  %v354_v40 = vld [vmem:[%s472_s3 + $0x8] sm:$0xff]   ;;  %339 = vmatprep.mubr.msk.bf16.mxu1 %vm376_vm1, %v375_v39  ;;  %335 = vmatprep.mubr.msk.bf16.mxu0 %vm376_vm1, %v375_v39 }
   0x3   :  { %v30_v10 = vunpack.c.l.bf16 %v25_v5  ;;  %349 = vmatpush3.bf16.msra.mxu1 %v353_v38  ;;  %332 = vmatpush3.bf16.msra.mxu0 %v353_v38  ;;  %v288_v58 = vld [vmem:[%s473_s1] ss:$0 sm:$0xff] }
   0x4   :  { %v38_v7 = vsel %vm31_vm0, %v312_v2, 0.0  ;;  %v32_v8 = vsel %vm31_vm0, %v308_v4, 0.0  ;;  %v41_v9 = vsel %vm31_vm0, %v313_v3, 0.0  ;;  %v35_v11 = vsel %vm31_vm0, %v309_v6, 0.0  ;;  %348 = vmatprep.subr.bf16.mxu1 %v375_v39  ;;  %333 = vmatprep.subr.bf16.mxu0 %v375_v39  ;;  %v289_v0 = vld [vmem:[%s474_s2] ss:$0 sm:$0xff] }
   0x5   :  { %39 = vadd.xlane.f32.xlu0 %v38_v7  ;;  %33 = vadd.xlane.f32.xlu1 %v32_v8  ;;  %v44_v12 = vsel %vm31_vm0, %v30_v10, 0.0 }
   0x7   :  { %350 = vmatpush3.bf16.msra.mxu1 %v354_v40  ;;  %334 = vmatpush3.bf16.msra.mxu0 %v354_v40 }
   0x9   :  { %42 = vadd.xlane.f32.xlu0 %v41_v9  ;;  %36 = vadd.xlane.f32.xlu1 %v35_v11 }
   0xd   :  { %45 = vadd.xlane.f32.xlu0 %v44_v12 }
  0x92   :  { %v40_v13 = vpop.xlane.xlu0 %39  ;;  %v34_v14 = vpop.xlane.xlu1 %33 }
  0x93   :  { %v50_v15 = vmul.f32 0.03125, %v40_v13  ;;  %v48_v16 = vmul.f32 0.03125, %v34_v14 }
  0x95   :  { %v421_v17 = vsub.f32 %v312_v2, %v50_v15  ;;  %v423_v18 = vsub.f32 %v308_v4, %v48_v16 }
  0x96   :  { %v43_v19 = vpop.xlane.xlu0 %42  ;;  %v37_v20 = vpop.xlane.xlu1 %36 }
  0x97   :  { %v51_v21 = vmul.f32 0.03125, %v43_v19  ;;  %v60_v22 = vmul.f32 %v421_v17, %v421_v17  ;;  %v49_v23 = vmul.f32 0.03125, %v37_v20  ;;  %v58_v24 = vmul.f32 %v423_v18, %v423_v18 }
  0x99   :  { %v56_v25 = vsub.f32 %v313_v3, %v51_v21  ;;  %v69_v26 = vsel %vm31_vm0, %v60_v22, 0.0  ;;  %v430_v27 = vsub.f32 %v309_v6, %v49_v23  ;;  %v63_v31 = vsel %vm31_vm0, %v58_v24, 0.0 }
  0x9a   :  { %v46_v28 = vpop.xlane.xlu0 %45  ;;  %70 = vadd.xlane.f32.xlu1 %v69_v26 }
  0x9b   :  { %v52_v29 = vmul.f32 0.03125, %v46_v28  ;;  %v61_v30 = vmul.f32 %v56_v25, %v56_v25  ;;  %v59_v32 = vmul.f32 %v430_v27, %v430_v27 }
  0x9d   :  { %v57_v33 = vsub.f32 %v30_v10, %v52_v29  ;;  %v72_v34 = vsel %vm31_vm0, %v61_v30, 0.0  ;;  %v66_v36 = vsel %vm31_vm0, %v59_v32, 0.0 }
  0x9e   :  { %73 = vadd.xlane.f32.xlu0 %v72_v34  ;;  %64 = vadd.xlane.f32.xlu1 %v63_v31 }
  0x9f   :  { %v62_v35 = vmul.f32 %v57_v33, %v57_v33 }
  0xa1   :  { %v75_v37 = vsel %vm31_vm0, %v62_v35, 0.0 }
  0xa2   :  { %76 = vadd.xlane.f32.xlu1 %v75_v37  ;;  %67 = vadd.xlane.f32.xlu0 %v66_v36 }
 0x127   :  { %v71_v41 = vpop.xlane.xlu1 %70 }
 0x128   :  { %v80_v42 = vmul.f32 0.03125, %v71_v41 }
 0x12a   :  { %v85_v43 = vadd.f32 1e-06, %v80_v42 }
 0x12b   :  { %v74_v44 = vpop.xlane.xlu0 %73  ;;  %v65_v45 = vpop.xlane.xlu1 %64 }
 0x12c   :  { %355 = vrsqrt.f32 %v85_v43  ;;  %v81_v46 = vmul.f32 0.03125, %v74_v44  ;;  %v78_v47 = vmul.f32 0.03125, %v65_v45 }
 0x12e   :  { %v86_v48 = vadd.f32 1e-06, %v81_v46  ;;  %v83_v49 = vadd.f32 1e-06, %v78_v47 }
 0x12f   :  { %v68_v50 = vpop.xlane.xlu0 %67  ;;  %v77_v51 = vpop.xlane.xlu1 %76 }
 0x130   :  { %357 = vrsqrt.f32 %v86_v48  ;;  %v79_v52 = vmul.f32 0.03125, %v68_v50  ;;  %v82_v53 = vmul.f32 0.03125, %v77_v51 }
 0x131   :  { %359 = vrsqrt.f32 %v83_v49 }
 0x132   :  { %v84_v54 = vadd.f32 1e-06, %v79_v52  ;;  %v87_v55 = vadd.f32 1e-06, %v82_v53 }
 0x134   :  { %361 = vrsqrt.f32 %v84_v54 }
 0x135   :  { %363 = vrsqrt.f32 %v87_v55 }
 0x136   :  { %v356_v56 = vpop.eup %355 }
 0x137   :  { %v95_v57 = vmul.f32 %v356_v56, %v421_v17  ;;  %v290_v17 = vld [vmem:[%s475_s4] ss:$0 sm:$0xff] }
 0x139   :  { %v107_v62 = vmul.f32 %v288_v58, %v95_v57 }
 0x13a   :  { %v358_v59 = vpop.eup %357 }
 0x13b   :  { %v360_v60 = vpop.eup %359  ;;  %v96_v61 = vmul.f32 %v358_v59, %v56_v25  ;;  %v119_v5 = vadd.f32 %v289_v0, %v107_v62 }
 0x13c   :  { %v93_v63 = vmul.f32 %v360_v60, %v423_v18 }
 0x13d   :  { %v108_v1 = vmul.f32 %v288_v58, %v96_v61 }
 0x13e   :  { %v362_v2 = vpop.eup %361  ;;  %v105_v7 = vmul.f32 %v288_v58, %v93_v63 }
 0x13f   :  { %v364_v3 = vpop.eup %363  ;;  %v94_v4 = vmul.f32 %v362_v2, %v430_v27  ;;  %v120_v6 = vadd.f32 %v289_v0, %v108_v1 }
 0x140   :  { %v97_v8 = vmul.f32 %v364_v3, %v57_v33  ;;  %v117_v12 = vadd.f32 %v289_v0, %v105_v7 }
 0x141   :  { %v123_v9 = vpack.c.bf16 %v120_v6, %v119_v5  ;;  %v106_v10 = vmul.f32 %v288_v58, %v94_v4 }
 0x142   :  { %v109_v11 = vmul.f32 %v288_v58, %v97_v8 }
 0x143   :  { %340 = vmatmul.mubr.msk.bf16.vlgmr.msra.gmra.mrb[0].mxu1 %vm31_vm0, %v123_v9  ;;  %v118_v13 = vadd.f32 %v289_v0, %v106_v10 }
 0x144   :  { %343 = vmatprep.mubr.msk.bf16.mxu1 %vm376_vm1, %v375_v39  ;;  %v121_v15 = vadd.f32 %v289_v0, %v109_v11 }
 0x145   :  { %v122_v14 = vpack.c.bf16 %v118_v13, %v117_v12 }
 0x146   :  { %v124_v16 = vpack.c.bf16 %v121_v15, %v121_v15 }
 0x147   :  { %336 = vmatmul.mubr.msk.bf16.vlgmr.msra.gmra.mrb[0].mxu0 %vm31_vm0, %v122_v14 }
 0x14b   :  { %344 = vmatmul.mubr.msk.bf16.gmra.mrb[4].mxu1 %vm31_vm0, %v124_v16 }
 0x216   :  { %v199_v18 = vpop.f32.mrb[0].mxu1 }
 0x217   :  { %v200_v19 = vadd.f32 %v290_v17, %v199_v18  ;;  %v341_v20 = vpop.f32.mrb[1].mxu1 }
 0x218   :  { %v202_v21 = vpop.f32.mrb[2].mxu1 }
 0x219   :  { %v220_v22 = vmul.f32 0.044715, %v200_v19  ;;  %v203_v23 = vadd.f32 %v290_v17, %v202_v21  ;;  %v342_v24 = vpop.f32.mrb[3].mxu1  ;;  %v215_v63 = vmul.f32 0.5, %v200_v19 }
 0x21a   :  { %v191_v25 = vpop.f32.mrb[0].mxu0 }
 0x21b   :  { %v225_v26 = vmul.f32 %v220_v22, %v200_v19  ;;  %v221_v27 = vmul.f32 0.044715, %v203_v23  ;;  %v192_v28 = vadd.f32 %v290_v17, %v191_v25  ;;  %v337_v29 = vpop.f32.mrb[1].mxu0  ;;  %v216_v0 = vmul.f32 0.5, %v203_v23 }
 0x21c   :  { %v194_v30 = vpop.f32.mrb[2].mxu0 }
 0x21d   :  { %v230_v31 = vmul.f32 %v225_v26, %v200_v19  ;;  %v226_v32 = vmul.f32 %v221_v27, %v203_v23  ;;  %v218_v33 = vmul.f32 0.044715, %v192_v28  ;;  %v338_v34 = vpop.f32.mrb[3].mxu0  ;;  %v195_v35 = vadd.f32 %v290_v17, %v194_v30 }
 0x21e   :  { %v207_v36 = vpop.f32.mrb[4].mxu1  ;;  %v213_v8 = vmul.f32 0.5, %v192_v28 }
 0x21f   :  { %v235_v37 = vadd.f32 %v230_v31, %v200_v19  ;;  %v231_v38 = vmul.f32 %v226_v32, %v203_v23  ;;  %v223_v39 = vmul.f32 %v218_v33, %v192_v28  ;;  %v208_v40 = vadd.f32 %v290_v17, %v207_v36  ;;  %v345_v41 = vpop.f32.mrb[5].mxu1 }
 0x220   :  { %v219_v42 = vmul.f32 0.044715, %v195_v35  ;;  %v210_v43 = vpop.f32.mrb[6].mxu1  ;;  %v214_v9 = vmul.f32 0.5, %v195_v35 }
 0x221   :  { %v240_v44 = vmul.f32 0.7978846, %v235_v37  ;;  %v236_v45 = vadd.f32 %v231_v38, %v203_v23  ;;  %v228_v46 = vmul.f32 %v223_v39, %v192_v28  ;;  %v346_v47 = vpop.f32.mrb[7].mxu1  ;;  %v222_v49 = vmul.f32 0.044715, %v208_v40 }
 0x222   :  { %v224_v48 = vmul.f32 %v219_v42, %v195_v35  ;;  %v217_v14 = vmul.f32 0.5, %v208_v40 }
 0x223   :  { %365 = vtanh.f32 %v240_v44  ;;  %v241_v50 = vmul.f32 0.7978846, %v236_v45  ;;  %v233_v51 = vadd.f32 %v228_v46, %v192_v28  ;;  %v227_v53 = vmul.f32 %v222_v49, %v208_v40 }
 0x224   :  { %v229_v52 = vmul.f32 %v224_v48, %v195_v35 }
 0x225   :  { %367 = vtanh.f32 %v241_v50  ;;  %v238_v54 = vmul.f32 0.7978846, %v233_v51  ;;  %v232_v56 = vmul.f32 %v227_v53, %v208_v40 }
 0x226   :  { %v234_v55 = vadd.f32 %v229_v52, %v195_v35 }
 0x227   :  { %369 = vtanh.f32 %v238_v54  ;;  %v237_v58 = vadd.f32 %v232_v56, %v208_v40 }
 0x228   :  { %v239_v57 = vmul.f32 0.7978846, %v234_v55 }
 0x229   :  { %v242_v59 = vmul.f32 0.7978846, %v237_v58 }
 0x22a   :  { %371 = vtanh.f32 %v239_v57 }
 0x22b   :  { %373 = vtanh.f32 %v242_v59 }
 0x22d   :  { %v366_v60 = vpop.eup %365 }
 0x22e   :  { %v250_v61 = vadd.f32 1.0, %v366_v60 }
 0x22f   :  { %v368_v62 = vpop.eup %367 }
 0x230   :  { %v251_v1 = vadd.f32 1.0, %v368_v62  ;;  %v255_v3 = vmul.f32 %v250_v61, %v215_v63 }
 0x231   :  { %v370_v2 = vpop.eup %369 }
 0x232   :  { %v256_v4 = vmul.f32 %v251_v1, %v216_v0  ;;  %v248_v5 = vadd.f32 1.0, %v370_v2 }
 0x234   :  { %v372_v6 = vpop.eup %371  ;;  %v322_v7 = vpack.c.bf16 %v256_v4, %v255_v3  ;;  %v253_v12 = vmul.f32 %v248_v5, %v213_v8 }
 0x235   :  { %v249_v10 = vadd.f32 1.0, %v372_v6  ;;  %v374_v11 = vpop.eup %373 }
 0x236   :  { %325 = vst [vmem:[%s476_s5 + $0x8] sm:$0xff] %v322_v7   ;;  %v252_v15 = vadd.f32 1.0, %v374_v11 }
 0x237   :  { %v254_v13 = vmul.f32 %v249_v10, %v214_v9 }
 0x238   :  { %v257_v17 = vmul.f32 %v252_v15, %v217_v14 }
 0x239   :  { %v317_v16 = vpack.c.bf16 %v254_v13, %v253_v12 }
 0x23a   :  { %v305_v18 = vpack.c.bf16 %v257_v17, %v257_v17 }
 0x23b   :  { %318 = vst [vmem:[%s476_s5] sm:$0xff] %v317_v16  }
 0x23c   :  { %283 = vst [vmem:[%s476_s5 + $0x10] sm:$0xf] %v305_v18 }

// kernel: _lambda_.17
= control target key start
LH: loop header
LB: loop body
LE: loop exit
PB: predicated region body
PF: predicated region fallthrough
CT: control target
= control target key end

     0   :  { %v327_v0 = vmov 0.0   ;;  %vm328_vm0 = vmmov 0   ;;  %vm217_vm1 = vcmask 257024   ;;  %s430_s1 = inlined_call_operand.vmem [shape: bf16[128,32], index: 1, kind: input, shape index: {}]   ;;  %s431_s0 = inlined_call_operand.vmem [shape: bf16[40,128], index: 0, kind: input, shape index: {}]   ;;  %s432_s2 = inlined_call_operand.vmem [shape: f32[1,32], index: 2, kind: input, shape index: {}]   ;;  %s433_s3 = inlined_call_operand.vmem [shape: bf16[40,32], index: 3, kind: input, shape index: {}]   ;;  %s434_s4 = inlined_call_operand.vmem [shape: f32[1,32], index: 4, kind: input, shape index: {}]   ;;  %s435_s5 = inlined_call_operand.vmem [shape: bf16[40,32], index: 5, kind: output, shape index: {}]  }
   0x1   :  { %298 = vmatprep.subr.bf16.mxu1 %v327_v0  ;;  %v316_v1 = vld [vmem:[%s430_s1] sm:$0xff]   ;;  %270 = vmatprep.subr.bf16.mxu0 %v327_v0  ;;  %v317_v2 = vld [vmem:[%s430_s1 + $0x8] sm:$0xff]   ;;  %v318_v3 = vld [vmem:[%s430_s1 + $0x10] sm:$0xff]  }
   0x2   :  { %290 = vmatprep.mubr.msk.bf16.mxu1 %vm328_vm0, %v327_v0  ;;  %286 = vmatprep.mubr.msk.bf16.mxu0 %vm328_vm0, %v327_v0  ;;  %v319_v4 = vld [vmem:[%s430_s1 + $0x18] sm:$0xff]   ;;  %v320_v5 = vld [vmem:[%s430_s1 + $0x20] sm:$0xff]   ;;  %v321_v6 = vld [vmem:[%s430_s1 + $0x28] sm:$0xff]  }
   0x3   :  { %306 = vmatpush3.bf16.msra.mxu1 %v316_v1  ;;  %271 = vmatpush3.bf16.msra.mxu0 %v316_v1  ;;  %v322_v7 = vld [vmem:[%s430_s1 + $0x30] sm:$0xff]   ;;  %v323_v8 = vld [vmem:[%s430_s1 + $0x38] sm:$0xff]   ;;  %v324_v9 = vld [vmem:[%s431_s0 + $0x8] sm:$0xff]  }
   0x4   :  { %299 = vmatprep.subr.bf16.mxu1 %v327_v0  ;;  %272 = vmatprep.subr.bf16.mxu0 %v327_v0  ;;  %v325_v10 = vld [vmem:[%s431_s0] sm:$0xff]   ;;  %v326_v11 = vld [vmem:[%s431_s0 + $0x10] ss:$0 sps:$4 sm:$0xff]   ;;  %v258_v13 = vld [vmem:[%s433_s3 + $0x8] sm:$0xff]  }
   0x5   :  { %v227_v12 = vld [vmem:[%s432_s2] ss:$0 sm:$0xff]  ;;  %v256_v19 = vunpack.c.l.bf16 %v258_v13  ;;  %v257_v25 = vunpack.c.h.bf16 %v258_v13  ;;  %v173_v38 = vld [vmem:[%s433_s3 + $0x10] sm:$0xf] }
   0x6   :  { %v251_v14 = vld [vmem:[%s433_s3] sm:$0xff]   ;;  %v178_v47 = vunpack.c.l.bf16 %v173_v38 }
   0x7   :  { %307 = vmatpush3.bf16.msra.mxu1 %v317_v2  ;;  %273 = vmatpush3.bf16.msra.mxu0 %v317_v2  ;;  %v239_v16 = vld [vmem:[%s434_s4] ss:$0 sm:$0xff]  ;;  %v252_v22 = vunpack.c.l.bf16 %v251_v14  ;;  %v253_v27 = vunpack.c.h.bf16 %v251_v14 }
   0x8   :  { %300 = vmatprep.subr.bf16.mxu1 %v327_v0  ;;  %274 = vmatprep.subr.bf16.mxu0 %v327_v0 }
   0xb   :  { %308 = vmatpush3.bf16.msra.mxu1 %v318_v3  ;;  %275 = vmatpush3.bf16.msra.mxu0 %v318_v3 }
   0xc   :  { %301 = vmatprep.subr.bf16.mxu1 %v327_v0  ;;  %276 = vmatprep.subr.bf16.mxu0 %v327_v0 }
   0xf   :  { %309 = vmatpush3.bf16.msra.mxu1 %v319_v4  ;;  %277 = vmatpush3.bf16.msra.mxu0 %v319_v4 }
  0x10   :  { %302 = vmatprep.subr.bf16.mxu1 %v327_v0  ;;  %278 = vmatprep.subr.bf16.mxu0 %v327_v0 }
  0x13   :  { %310 = vmatpush3.bf16.msra.mxu1 %v320_v5  ;;  %279 = vmatpush3.bf16.msra.mxu0 %v320_v5 }
  0x14   :  { %303 = vmatprep.subr.bf16.mxu1 %v327_v0  ;;  %280 = vmatprep.subr.bf16.mxu0 %v327_v0 }
  0x17   :  { %311 = vmatpush3.bf16.msra.mxu1 %v321_v6  ;;  %281 = vmatpush3.bf16.msra.mxu0 %v321_v6 }
  0x18   :  { %304 = vmatprep.subr.bf16.mxu1 %v327_v0  ;;  %282 = vmatprep.subr.bf16.mxu0 %v327_v0 }
  0x1b   :  { %312 = vmatpush3.bf16.msra.mxu1 %v322_v7  ;;  %283 = vmatpush3.bf16.msra.mxu0 %v322_v7 }
  0x1c   :  { %305 = vmatprep.subr.bf16.mxu1 %v327_v0  ;;  %284 = vmatprep.subr.bf16.mxu0 %v327_v0 }
  0x1f   :  { %313 = vmatpush3.bf16.msra.mxu1 %v323_v8  ;;  %285 = vmatpush3.bf16.msra.mxu0 %v323_v8 }
  0x22   :  { %291 = vmatmul.mubr.bf16.vlgmr.msra.gmra.mrb[0].mxu1 %v324_v9  ;;  %287 = vmatmul.mubr.bf16.vlgmr.msra.gmra.mrb[0].mxu0 %v325_v10 }
  0x23   :  { %294 = vmatprep.mubr.msk.bf16.mxu1 %vm328_vm0, %v327_v0 }
  0x2a   :  { %295 = vmatmul.mubr.bf16.gmra.mrb[4].mxu1 %v326_v11 }
  0xf5   :  { %v155_v15 = vpop.f32.mrb[0].mxu1  ;;  %v147_v17 = vpop.f32.mrb[0].mxu0 }
  0xf6   :  { %v156_v18 = vadd.f32 %v227_v12, %v155_v15  ;;  %v292_v20 = vpop.f32.mrb[1].mxu1  ;;  %v148_v21 = vadd.f32 %v227_v12, %v147_v17  ;;  %v288_v23 = vpop.f32.mrb[1].mxu0 }
  0xf7   :  { %v158_v24 = vpop.f32.mrb[2].mxu1  ;;  %v150_v26 = vpop.f32.mrb[2].mxu0 }
  0xf8   :  { %v188_v28 = vmul.f32 %v239_v16, %v156_v18  ;;  %v159_v29 = vadd.f32 %v227_v12, %v158_v24  ;;  %v186_v30 = vmul.f32 %v239_v16, %v148_v21  ;;  %v293_v31 = vpop.f32.mrb[3].mxu1  ;;  %v151_v32 = vadd.f32 %v227_v12, %v150_v26  ;;  %v289_v33 = vpop.f32.mrb[3].mxu0 }
  0xfa   :  { %v193_v34 = vadd.f32 %v256_v19, %v188_v28  ;;  %v189_v35 = vmul.f32 %v239_v16, %v159_v29  ;;  %v191_v36 = vadd.f32 %v252_v22, %v186_v30  ;;  %v187_v37 = vmul.f32 %v239_v16, %v151_v32 }
  0xfc   :  { %v247_v39 = vpack.c.bf16 %v193_v34, %v193_v34  ;;  %v194_v40 = vadd.f32 %v257_v25, %v189_v35  ;;  %v245_v41 = vpack.c.bf16 %v191_v36, %v191_v36  ;;  %v192_v42 = vadd.f32 %v253_v27, %v187_v37 }
  0xfd   :  { %v163_v43 = vpop.f32.mrb[4].mxu1 }
  0xfe   :  { %220 = vst.msk [vmem:[%s435_s5 + $0x8] sm:$0xf] %vm217_vm1, %v247_v39  ;;  %v248_v44 = vpack.c.bf16 %v194_v40, %v194_v40  ;;  %218 = vst.msk [vmem:[%s435_s5] sm:$0xf] %vm217_vm1, %v245_v41  ;;  %v246_v45 = vpack.c.bf16 %v192_v42, %v192_v42  ;;  %v164_v46 = vadd.f32 %v227_v12, %v163_v43  ;;  %v296_v48 = vpop.f32.mrb[5].mxu1 }
  0xff   :  { %v166_v49 = vpop.f32.mrb[6].mxu1 }
 0x100   :  { %221 = vst.msk [vmem:[%s435_s5 + $0xc] sm:$0xf] %vm217_vm1, %v248_v44  ;;  %219 = vst.msk [vmem:[%s435_s5 + $0x4] sm:$0xf] %vm217_vm1, %v246_v45  ;;  %v190_v50 = vmul.f32 %v239_v16, %v164_v46  ;;  %v297_v51 = vpop.f32.mrb[7].mxu1 }
 0x102   :  { %v195_v52 = vadd.f32 %v190_v50, %v178_v47 }
 0x104   :  { %v249_v53 = vpack.c.bf16 %v195_v52, %v195_v52 }
 0x106   :  { %222 = vst.msk [vmem:[%s435_s5 + $0x10] sm:$0xf] %vm217_vm1, %v249_v53 }

// kernel: _lambda_.23
= control target key start
LH: loop header
LB: loop body
LE: loop exit
PB: predicated region body
PF: predicated region fallthrough
CT: control target
= control target key end

     0   :  { %8 = vsyncpa [#allocation3], 0  ;;  %s520_s0 = inlined_call_operand.vmem [shape: bf16[2,4,32], index: 0, kind: input, shape index: {}]   ;;  %s521_s1 = inlined_call_operand.vmem [shape: f32[1,32], index: 1, kind: input, shape index: {}]   ;;  %s522_s2 = inlined_call_operand.vmem [shape: f32[1,32], index: 2, kind: input, shape index: {}]   ;;  %s523_s3 = inlined_call_operand.hbm [shape: f32[2,1,32], index: 3, kind: output, shape index: {}]  }
   0x1   :  { %10 = vsyncpa [#allocation3 + $0x1], 0  ;;  %s411_s12 = smov 0   ;;  %s413_s13 = smov 0  }
   0x2   :  { %s415_s14 = smov 0   ;;  %s417_s15 = smov 0  }
   0x3 LB: > { %s432_s16 = sadd.s32 4294967295, %s388_s15   ;;  %s275_s17 = sadd.s32 4294967294, %s388_s15   ;;  %s388_s15 = sphi %s417_s15, %s529_s15   ;;  %s384_s14 = sphi %s415_s14, %s528_s14   ;;  %s380_s13 = sphi %s413_s13, %s527_s13   ;;  %s376_s12 = sphi %s411_s12, %s526_s12  }
   0x4   : > { %s436_s18 = sadd.s32 1, %s388_s15   ;;  %s91_s19 = sadd.s32 1, %s384_s14 }
   0x5   : > { %s88_s20 = ssub.s32 %s388_s15, %s436_s18  ;;  %p101_p0 = scmp.ne.s32.totalorder %s384_s14, %s380_s13 }
   0x6   : > { %p89_p1 = scmp.eq.s32.totalorder %s88_s20, 0  ;;  %p102_p2 = scmp.eq.s32.totalorder %s432_s16, 1 }
   0x7   : > { %p107_p3 = scmp.ne.s32.totalorder %s380_s13, %s376_s12  ;;  %p108_p4 = scmp.eq.s32.totalorder %s275_s17, 1 }
   0x8   : > { %s447_s21 = scalar_select %p89_p1, %s384_s14, %s91_s19  }
   0x9   : > { %p449_p5 = por %p102_p2, %p101_p0  ;;  %p453_p6 = por %p108_p4, %p107_p3 }
   0xa   : > { %p278_p7 = scmp.ge.s32.totalorder %s388_s15, 1  ;;  %p139_p8 = scmp.lt.s32.totalorder %s388_s15, 3 }
   0xc   : > { %p140_p9 = pnand %p278_p7, %p139_p8 }
   0xd   : > { %p161_p10 = scmp.lt.s32.totalorder (!%p140_p9), %s432_s16, 1  ;;  %vm167_vm0 = vcmask (!%p140_p9), 257024   ;;  %v280_v12 = vld [vmem:[%s521_s1] ss:$0 sm:$0xff] (!%p140_p9)  ;;  %s159_s6 = sand.u32 (!%p140_p9), 1, %s380_s13   ;;  %vm205_vm1 = vcmask (!%p140_p9), 253952  }
   0xe   : > { %143 = sbr.rel (%p140_p9) target bundleno = 368 (0x170), region = 32  ;;  %v281_v14 = vld [vmem:[%s522_s2] ss:$0 sm:$0xff] (!%p140_p9)  ;;  %s282_s7 = sshll.u32 (!%p140_p9), %s432_s16, 4 }
   0xf   : > { %s160_s8 = scalar_lea.vmem (!%p140_p9), [#allocation2], %s159_s6  ;;  %s478_s17 = scalar_lea.hbm (!%p140_p9), %s523_s3, %s282_s7 }
  0x10   : > { %s220_s9 = sshll.u32 (!%p140_p9), %s160_s8, 4  ;;  %s208_s19 = scalar_lea.sflag (!%p140_p9), [#allocation3], %s159_s6  ;;  %s480_s9 = int_to_ptr.vmem [resolvable:$true] %s220_s9 }
  0x11   : > { %s326_s20 = scalar_lea.vmem (!%p140_p9), %s480_s9, 16 }
  0x12   : > { %p327_p11 = scmp.ne.s32.totalorder (!%p140_p9), %s480_s9, %s326_s20 }
  0x14   : > { %p328_p12 = pnand (!%p140_p9), %p327_p11, %p449_p5 }
  0x15   : > { %s162_s24 = scalar_select %p161_p10, %s432_s16, 1 }
  0x16   : > { %p329_p13 = pneg %p328_p12  ;;  %s390_s16 = smov [#allocation2]  }
  0x17   : > { %s279_s25 = sshll.u32 %s162_s24, 1  ;;  %s330_s24 = sshll.u32 %s390_s16, 4  ;;  %s331_s24 = int_to_ptr.vmem [resolvable:$false] %s330_s24 }
  0x18   : > { %s164_s28 = scalar_lea.vmem %s520_s0, %s279_s25  ;;  %s332_s25 = scalar_lea.vmem %s331_s24, 32 }
  0x19   : > { %v165_v0 = vld [vmem:[%s164_s28] sm:$0x3]  ;;  %p333_p0 = scmp.lt.s32.totalorder %s480_s9, %s331_s24  ;;  %p334_p1 = scmp.lt.s32.totalorder %s332_s25, %s326_s20 }
  0x1a   : > { %v166_v1 = vunpack.c.l.bf16 %v165_v0 }
  0x1b   : > { %p335_p2 = por %p334_p1, %p333_p0 }
  0x1c   : > { %v168_v2 = vsel %vm167_vm0, %v166_v1, 0.0 }
  0x1d   : > { %169 = vadd.xlane.f32.xlu0 %v168_v2  ;;  %p336_p3 = pnand %p335_p2, %p329_p13 }
  0xaa   : > { %v170_v3 = vpop.xlane.xlu0 %169 }
  0xab   : > { %v172_v4 = vmul.f32 0.03125, %v170_v3 }
  0xad   : > { %v173_v5 = vsub.f32 %v166_v1, %v172_v4 }
  0xaf   : > { %v174_v6 = vmul.f32 %v173_v5, %v173_v5 }
  0xb1   : > { %v175_v7 = vsel %vm167_vm0, %v174_v6, 0.0 }
  0xb2   : > { %176 = vadd.xlane.f32.xlu0 %v175_v7 }
 0x13f   : > { %v177_v8 = vpop.xlane.xlu0 %176 }
 0x140   : > { %v178_v9 = vmul.f32 0.03125, %v177_v8 }
 0x142   : > { %v179_v10 = vadd.f32 1e-06, %v178_v9 }
 0x144   : > { %324 = vrsqrt.f32 %v179_v10 }
 0x14e   : > { %v325_v11 = vpop.eup %324 }
 0x14f   : > { %v181_v13 = vmul.f32 %v325_v11, %v173_v5 }
 0x151   : > { %v189_v15 = vmul.f32 %v280_v12, %v181_v13 }
 0x153   : > { %v197_v16 = vadd.f32 %v281_v14, %v189_v15 }
 0x155   : > { %v198_v17 = vsel %vm167_vm0, %v197_v16, -inf }
 0x156   : > { %v199_v18 = vrot.slane %v198_v17, 4 }
 0x158   : > { %v200_v19 = vmax.f32 %v198_v17, %v199_v18 }
 0x15a   : > { %v201_v20 = vrot.slane %v200_v19, 2 }
 0x15c   : > { %v202_v21 = vmax.f32 %v200_v19, %v201_v20 }
 0x15e   : > { %v203_v22 = vrot.slane %v202_v21, 1 }
 0x160   : > { %v204_v23 = vmax.f32 %v202_v21, %v203_v22 }
 0x162   : > { %206 = vst.msk [vmem:[%s160_s8] sm:$0x1] %vm205_vm1, %v204_v23 }
 0x163   : > { %339 = shalt.err (!%p336_p3)
}
 0x164   : > { %s340_s26 = scalar_lea.hbm %s478_s17, 16  ;;  %s344_s29 = scalar_lea.hbm %s523_s3, 32 }
 0x165   : > { %p341_p4 = scmp.ne.s32.totalorder %s478_s17, %s340_s26  ;;  %p345_p9 = scmp.lt.u32.totalorder %s478_s17, %s523_s3 }
 0x166   : > { %p346_p10 = scmp.lt.u32.totalorder %s344_s29, %s340_s26  ;;  %p348_p12 = scmp.lt.u32.totalorder %s340_s26, %s478_s17 }
 0x167   : > { %p342_p7 = pnand %p341_p4, %p449_p5 }
 0x168   : > { %p347_p11 = por %p346_p10, %p345_p9 }
 0x169   : > { %p343_p8 = pneg %p342_p7 }
 0x16a   : > { %p349_p13 = por %p348_p12, %p347_p11 }
 0x16c   : > { %p350_p0 = pnand %p349_p13, %p343_p8 }
 0x16e   : > { %353 = shalt.err (!%p350_p0)
}
 0x16f   : > { %285 = dma.vmem_to_hbm [thread:$0]  (%p449_p5), %s480_s9, 16, %s478_s17, %s208_s19  }
 0x170 PF: > { %p291_p1 = scmp.ge.s32.totalorder %s388_s15, 2  ;;  %s232_s5 = sand.u32 1, %s376_s12  }
 0x171   : > { %s233_s6 = scalar_lea.sflag [#allocation3], %s232_s5 }
 0x172   : > { %p288_p2 = pnand %p291_p1, %p453_p6 }
 0x174   : > { %371 = dma.done.wait (!%p288_p2), %s233_s6, 16  }
 0x175   : > { %373 = vsyncadd (!%p288_p2), %s233_s6, 4294967280  ;;  %p13_p3 = scmp.ge.s32.totalorder %s436_s18, 4   ;;  %s526_s12 = smov %s380_s13 }
 0x176   : > { %s527_s13 = smov %s384_s14  ;;  %s528_s14 = smov %s447_s21 }
 0x177   : > { %s529_s15 = smov %s436_s18  ;;  %15 = sbr.rel (!%p13_p3) target bundleno = 3 (0x3), region = 67 }
 0x17e   :  { %237 = vsyncpa [#allocation3], 1 }
 0x17f   :  { %239 = vsyncpa [#allocation3 + $0x1], 1 }

</bundles_post_ra>
